<compile_context>
chip_gen: v5e
topology: v5e:2x2
jax: 0.10.0
libtpu: 0.0.40
codegen_flags: <defaults>
</compile_context>

<pallas_src>
import jax
import jax.numpy as jnp
from jax.experimental import pallas as pl
from jax.experimental.pallas import tpu as pltpu

JOINT_LIMITS = [2.967, 2.094, 2.967, 2.094, 2.967, 2.094, 3.054]
N_JOINTS = 7
N_LINKS = 2                       # kp_link_1, kp_link_2
N_KEYPT_DIM = 3                   # xyz per link
N_KEYPTS = N_LINKS * N_KEYPT_DIM  # 6
TILE = 256                        # batch samples (lanes) per grid step


def _mpc_forward_kernel(x_ref, u_ref, tl_ref, w_ref, b_ref, xd_ref, kp_ref):
    """One batch tile.

    x_ref, u_ref : (7, T) f32 VMEM  — joints on sublanes, batch on lanes.
    tl_ref       : (7, 1) f32 VMEM  — joint limits (broadcast along lanes).
    w_ref        : (6, 14) f32 SMEM — fused [sin | cos] weights, pre-scaled x100.
    b_ref        : (6,)   f32 SMEM  — bias, pre-scaled x100.
    xd_ref       : (7, T) f32 VMEM out — clamped xdesired.
    kp_ref       : (6, T) f32 VMEM out — keypoints.
    """
    tl = tl_ref[...]                              # (7, 1)
    xd = x_ref[...] + u_ref[...]                  # (7, T)
    # torch.where(xd > tl, tl, xd); torch.where(xd < -tl, -tl, xd)  ==  clamp
    xd = jnp.minimum(xd, tl)
    xd = jnp.maximum(xd, -tl)
    xd_ref[...] = xd

    # FK surrogate features (EUP; VALU/scalar slots stay free).
    s = jnp.sin(xd)                               # (7, T)
    c = jnp.cos(xd)
    s_rows = [s[j, :] for j in range(N_JOINTS)]   # hoisted sublane extracts
    c_rows = [c[j, :] for j in range(N_JOINTS)]

    # VPU contraction: 6 output rows x 14 scalar-weight FMAs (weights in SMEM).
    # MXU at K=14, N=6 would be ~100% pad + fill/drain latency.
    for r in range(N_KEYPTS):
        acc = s_rows[0] * w_ref[r, 0]
        for j in range(1, N_JOINTS):
            acc = acc + s_rows[j] * w_ref[r, j]
        for j in range(N_JOINTS):
            acc = acc + c_rows[j] * w_ref[r, N_JOINTS + j]
        kp_ref[r, :] = acc + b_ref[r]             # scale/bias already folded in


def mpc_forward_batched(x, u, tl, w_sin, w_cos, b, *, tile=TILE):
    """Batched forward of the MPC wrapper.

    x, u   : (B, 7) f32 joint states / actions (u broadcastable, e.g. 0.0).
    tl     : (7,)   f32 joint limits.
    w_sin, w_cos : (7, 6) f32 FK-surrogate weights;  b : (6,) f32 bias.
    Returns (xdesired (B, 7), keypoints (B, 6)).
    """
    x = jnp.asarray(x, jnp.float32)
    B = x.shape[0]
    u = jnp.broadcast_to(jnp.asarray(u, jnp.float32), (B, N_JOINTS))

    # Fold the x100 scale and fuse the two matmuls into one (6, 14) weight.
    w_fused = 100.0 * jnp.concatenate(
        [jnp.asarray(w_sin, jnp.float32), jnp.asarray(w_cos, jnp.float32)],
        axis=0).T                                              # (6, 14)
    b_fused = 100.0 * jnp.asarray(b, jnp.float32).reshape(N_KEYPTS)

    # Lane-dense layout: batch on the lane axis (transpose once, outside).
    xT = x.T                                                   # (7, B)
    uT = u.T                                                   # (7, B)
    tl_col = jnp.asarray(tl, jnp.float32).reshape(N_JOINTS, 1)

    n_tiles = pl.cdiv(B, tile)
    Bp = n_tiles * tile
    if Bp != B:
        pad = Bp - B
        xT = jnp.pad(xT, ((0, 0), (0, pad)))
        uT = jnp.pad(uT, ((0, 0), (0, pad)))

    smem = pl.BlockSpec(memory_space=pltpu.MemorySpace.SMEM)
    xd_t, kp_t = pl.pallas_call(
        _mpc_forward_kernel,
        out_shape=(
            jax.ShapeDtypeStruct((N_JOINTS, Bp), jnp.float32),
            jax.ShapeDtypeStruct((N_KEYPTS, Bp), jnp.float32),
        ),
        grid=(n_tiles,),
        in_specs=[
            pl.BlockSpec((N_JOINTS, tile), lambda i: (0, i)),   # x
            pl.BlockSpec((N_JOINTS, tile), lambda i: (0, i)),   # u
            pl.BlockSpec((N_JOINTS, 1), lambda i: (0, 0)),      # joint limits
            smem,                                               # fused weights
            smem,                                               # fused bias
        ],
        out_specs=(
            pl.BlockSpec((N_JOINTS, tile), lambda i: (0, i)),   # xdesired
            pl.BlockSpec((N_KEYPTS, tile), lambda i: (0, i)),   # keypoints
        ),
        compiler_params=pltpu.CompilerParams(
            dimension_semantics=("parallel",)),
    )(xT, uT, tl_col, w_fused, b_fused)

    return xd_t[:, :B].T, kp_t[:, :B].T


def mpc_forward(x, u, tl, w_sin, w_cos, b):
    """Single-sample forward matching the torch module signature: x, u: (7,)."""
    xd, kp = mpc_forward_batched(x.reshape(1, N_JOINTS), u, tl, w_sin, w_cos, b)
    return xd.reshape(N_JOINTS), kp.reshape(N_KEYPTS)


def _reference_forward_batched(x, u, tl, w_sin, w_cos, b):
    """Plain-JAX reference with the torch module's exact where-based clamps."""
    xd = x + u
    xd = jnp.where(xd > tl, tl, xd)
    xd = jnp.where(xd < -tl, -tl, xd)
    kp = 100.0 * (jnp.sin(xd) @ w_sin + jnp.cos(xd) @ w_cos + b.reshape(1, -1))
    return xd, kp


if __name__ == "__main__":
    key = jax.random.PRNGKey(0)
    k_x, k_u, k_ws, k_wc, k_b = jax.random.split(key, 5)

    B = 2 * TILE                                                # 512 samples
    tl = jnp.asarray(JOINT_LIMITS, dtype=jnp.float32)           # (7,)
    # Joint states scaled so some joints exceed the limits -> exercises clamp.
    x = 4.0 * jax.random.normal(k_x, (B, N_JOINTS), dtype=jnp.float32)
    u = 0.1 * jax.random.normal(k_u, (B, N_JOINTS), dtype=jnp.float32)

    # Deterministic synthetic FK-surrogate parameters (2 links * 3 coords = 6).
    w_sin = 0.3 * jax.random.normal(k_ws, (N_JOINTS, N_KEYPTS), dtype=jnp.float32)
    w_cos = 0.3 * jax.random.normal(k_wc, (N_JOINTS, N_KEYPTS), dtype=jnp.float32)
    b = 0.05 * jax.random.normal(k_b, (N_KEYPTS,), dtype=jnp.float32)

    xdesired, keypoints = mpc_forward_batched(x, u, tl, w_sin, w_cos, b)
    jax.block_until_ready((xdesired, keypoints))

    # Correctness vs. plain-JAX reference of the same math.
    xd_ref, kp_ref = _reference_forward_batched(x, u, tl, w_sin, w_cos, b)
    assert xdesired.shape == (B, N_JOINTS) and keypoints.shape == (B, N_KEYPTS)
    assert jnp.allclose(xdesired, xd_ref, atol=1e-6)
    assert jnp.allclose(keypoints, kp_ref, atol=2e-3)

    # Also exercise the single-sample path (torch forward signature).
    xd1, kp1 = mpc_forward(x[0], u[0], tl, w_sin, w_cos, b)
    jax.block_until_ready((xd1, kp1))
    assert jnp.allclose(xd1, xd_ref[0], atol=1e-6)
    assert jnp.allclose(kp1, kp_ref[0], atol=2e-3)

    print("KERNEL_OK")
</pallas_src>

<mosaic_0001>
module attributes {stable_mosaic.version = 11 : i64} {
  func.func @_mpc_forward_kernel(%arg0: i32, %arg1: memref<7x256xf32, #tpu.memory_space<vmem>>, %arg2: memref<7x256xf32, #tpu.memory_space<vmem>>, %arg3: memref<7x1xf32, #tpu.memory_space<vmem>>, %arg4: memref<6x14xf32, #tpu.memory_space<smem>>, %arg5: memref<6xf32, #tpu.memory_space<smem>>, %arg6: memref<7x256xf32, #tpu.memory_space<vmem>>, %arg7: memref<6x256xf32, #tpu.memory_space<vmem>>) attributes {dimension_semantics = [#tpu.dimension_semantics<parallel>], iteration_bounds = array<i64: 2>, scalar_prefetch = 0 : i64, scratch_operands = 0 : i64, tpu.core_type = #tpu.core_type<tc>, window_params = [{transform_indices = @transform_0, window_bounds = array<i64: 7, 256>}, {transform_indices = @transform_1, window_bounds = array<i64: 7, 256>}, {pipeline_mode = #tpu.pipeline_mode<synchronous>, transform_indices = @transform_2, window_bounds = array<i64: 7, 1>}, {transform_indices = @transform_3, window_bounds = array<i64: 6, 14>}, {transform_indices = @transform_4, window_bounds = array<i64: 6>}, {transform_indices = @transform_5, window_bounds = array<i64: 7, 256>}, {transform_indices = @transform_6, window_bounds = array<i64: 6, 256>}]} {
    %c0 = arith.constant 0 : index
    %c0_0 = arith.constant 0 : index
    %0 = vector.load %arg3[%c0, %c0_0] : memref<7x1xf32, #tpu.memory_space<vmem>>, vector<7x1xf32>
    %c0_1 = arith.constant 0 : index
    %c0_2 = arith.constant 0 : index
    %1 = vector.load %arg1[%c0_1, %c0_2] : memref<7x256xf32, #tpu.memory_space<vmem>>, vector<7x256xf32>
    %c0_3 = arith.constant 0 : index
    %c0_4 = arith.constant 0 : index
    %2 = vector.load %arg2[%c0_3, %c0_4] : memref<7x256xf32, #tpu.memory_space<vmem>>, vector<7x256xf32>
    %3 = arith.addf %1, %2 : vector<7x256xf32>
    %4 = vector.broadcast %0 : vector<7x1xf32> to vector<7x256xf32>
    %5 = arith.minimumf %3, %4 : vector<7x256xf32>
    %cst = arith.constant 0.000000e+00 : f32
    %6 = vector.broadcast %cst : f32 to vector<7x1xf32>
    %7 = arith.subf %6, %0 : vector<7x1xf32>
    %8 = vector.broadcast %7 : vector<7x1xf32> to vector<7x256xf32>
    %9 = arith.maximumf %5, %8 : vector<7x256xf32>
    %c0_5 = arith.constant 0 : index
    %c0_6 = arith.constant 0 : index
    %10 = vector.load %arg6[%c0_5, %c0_6] : memref<7x256xf32, #tpu.memory_space<vmem>>, vector<7x256xf32>
    tpu.vector_store %arg6[%c0_5, %c0_6], %9 {strides = array<i32>} : memref<7x256xf32, #tpu.memory_space<vmem>>, vector<7x256xf32>,
    %11 = math.sin %9 : vector<7x256xf32>
    %12 = math.cos %9 : vector<7x256xf32>
    %13 = vector.extract_strided_slice %11 {offsets = [0, 0], sizes = [1, 256], strides = [1, 1]} : vector<7x256xf32> to vector<1x256xf32>
    %14 = vector.shape_cast %13 : vector<1x256xf32> to vector<256xf32>
    %15 = vector.extract_strided_slice %11 {offsets = [1, 0], sizes = [1, 256], strides = [1, 1]} : vector<7x256xf32> to vector<1x256xf32>
    %16 = vector.shape_cast %15 : vector<1x256xf32> to vector<256xf32>
    %17 = vector.extract_strided_slice %11 {offsets = [2, 0], sizes = [1, 256], strides = [1, 1]} : vector<7x256xf32> to vector<1x256xf32>
    %18 = vector.shape_cast %17 : vector<1x256xf32> to vector<256xf32>
    %19 = vector.extract_strided_slice %11 {offsets = [3, 0], sizes = [1, 256], strides = [1, 1]} : vector<7x256xf32> to vector<1x256xf32>
    %20 = vector.shape_cast %19 : vector<1x256xf32> to vector<256xf32>
    %21 = vector.extract_strided_slice %11 {offsets = [4, 0], sizes = [1, 256], strides = [1, 1]} : vector<7x256xf32> to vector<1x256xf32>
    %22 = vector.shape_cast %21 : vector<1x256xf32> to vector<256xf32>
    %23 = vector.extract_strided_slice %11 {offsets = [5, 0], sizes = [1, 256], strides = [1, 1]} : vector<7x256xf32> to vector<1x256xf32>
    %24 = vector.shape_cast %23 : vector<1x256xf32> to vector<256xf32>
    %25 = vector.extract_strided_slice %11 {offsets = [6, 0], sizes = [1, 256], strides = [1, 1]} : vector<7x256xf32> to vector<1x256xf32>
    %26 = vector.shape_cast %25 : vector<1x256xf32> to vector<256xf32>
    %27 = vector.extract_strided_slice %12 {offsets = [0, 0], sizes = [1, 256], strides = [1, 1]} : vector<7x256xf32> to vector<1x256xf32>
    %28 = vector.shape_cast %27 : vector<1x256xf32> to vector<256xf32>
    %29 = vector.extract_strided_slice %12 {offsets = [1, 0], sizes = [1, 256], strides = [1, 1]} : vector<7x256xf32> to vector<1x256xf32>
    %30 = vector.shape_cast %29 : vector<1x256xf32> to vector<256xf32>
    %31 = vector.extract_strided_slice %12 {offsets = [2, 0], sizes = [1, 256], strides = [1, 1]} : vector<7x256xf32> to vector<1x256xf32>
    %32 = vector.shape_cast %31 : vector<1x256xf32> to vector<256xf32>
    %33 = vector.extract_strided_slice %12 {offsets = [3, 0], sizes = [1, 256], strides = [1, 1]} : vector<7x256xf32> to vector<1x256xf32>
    %34 = vector.shape_cast %33 : vector<1x256xf32> to vector<256xf32>
    %35 = vector.extract_strided_slice %12 {offsets = [4, 0], sizes = [1, 256], strides = [1, 1]} : vector<7x256xf32> to vector<1x256xf32>
    %36 = vector.shape_cast %35 : vector<1x256xf32> to vector<256xf32>
    %37 = vector.extract_strided_slice %12 {offsets = [5, 0], sizes = [1, 256], strides = [1, 1]} : vector<7x256xf32> to vector<1x256xf32>
    %38 = vector.shape_cast %37 : vector<1x256xf32> to vector<256xf32>
    %39 = vector.extract_strided_slice %12 {offsets = [6, 0], sizes = [1, 256], strides = [1, 1]} : vector<7x256xf32> to vector<1x256xf32>
    %40 = vector.shape_cast %39 : vector<1x256xf32> to vector<256xf32>
    %c0_7 = arith.constant 0 : index
    %c0_8 = arith.constant 0 : index
    %41 = memref.load %arg4[%c0_7, %c0_8] : memref<6x14xf32, #tpu.memory_space<smem>>
    %42 = vector.broadcast %41 : f32 to vector<256xf32>
    %43 = arith.mulf %14, %42 : vector<256xf32>
    %c0_9 = arith.constant 0 : index
    %c1 = arith.constant 1 : index
    %44 = memref.load %arg4[%c0_9, %c1] : memref<6x14xf32, #tpu.memory_space<smem>>
    %45 = vector.broadcast %44 : f32 to vector<256xf32>
    %46 = arith.mulf %16, %45 : vector<256xf32>
    %47 = arith.addf %43, %46 : vector<256xf32>
    %c0_10 = arith.constant 0 : index
    %c2 = arith.constant 2 : index
    %48 = memref.load %arg4[%c0_10, %c2] : memref<6x14xf32, #tpu.memory_space<smem>>
    %49 = vector.broadcast %48 : f32 to vector<256xf32>
    %50 = arith.mulf %18, %49 : vector<256xf32>
    %51 = arith.addf %47, %50 : vector<256xf32>
    %c0_11 = arith.constant 0 : index
    %c3 = arith.constant 3 : index
    %52 = memref.load %arg4[%c0_11, %c3] : memref<6x14xf32, #tpu.memory_space<smem>>
    %53 = vector.broadcast %52 : f32 to vector<256xf32>
    %54 = arith.mulf %20, %53 : vector<256xf32>
    %55 = arith.addf %51, %54 : vector<256xf32>
    %c0_12 = arith.constant 0 : index
    %c4 = arith.constant 4 : index
    %56 = memref.load %arg4[%c0_12, %c4] : memref<6x14xf32, #tpu.memory_space<smem>>
    %57 = vector.broadcast %56 : f32 to vector<256xf32>
    %58 = arith.mulf %22, %57 : vector<256xf32>
    %59 = arith.addf %55, %58 : vector<256xf32>
    %c0_13 = arith.constant 0 : index
    %c5 = arith.constant 5 : index
    %60 = memref.load %arg4[%c0_13, %c5] : memref<6x14xf32, #tpu.memory_space<smem>>
    %61 = vector.broadcast %60 : f32 to vector<256xf32>
    %62 = arith.mulf %24, %61 : vector<256xf32>
    %63 = arith.addf %59, %62 : vector<256xf32>
    %c0_14 = arith.constant 0 : index
    %c6 = arith.constant 6 : index
    %64 = memref.load %arg4[%c0_14, %c6] : memref<6x14xf32, #tpu.memory_space<smem>>
    %65 = vector.broadcast %64 : f32 to vector<256xf32>
    %66 = arith.mulf %26, %65 : vector<256xf32>
    %67 = arith.addf %63, %66 : vector<256xf32>
    %c0_15 = arith.constant 0 : index
    %c7 = arith.constant 7 : index
    %68 = memref.load %arg4[%c0_15, %c7] : memref<6x14xf32, #tpu.memory_space<smem>>
    %69 = vector.broadcast %68 : f32 to vector<256xf32>
    %70 = arith.mulf %28, %69 : vector<256xf32>
    %71 = arith.addf %67, %70 : vector<256xf32>
    %c0_16 = arith.constant 0 : index
    %c8 = arith.constant 8 : index
    %72 = memref.load %arg4[%c0_16, %c8] : memref<6x14xf32, #tpu.memory_space<smem>>
    %73 = vector.broadcast %72 : f32 to vector<256xf32>
    %74 = arith.mulf %30, %73 : vector<256xf32>
    %75 = arith.addf %71, %74 : vector<256xf32>
    %c0_17 = arith.constant 0 : index
    %c9 = arith.constant 9 : index
    %76 = memref.load %arg4[%c0_17, %c9] : memref<6x14xf32, #tpu.memory_space<smem>>
    %77 = vector.broadcast %76 : f32 to vector<256xf32>
    %78 = arith.mulf %32, %77 : vector<256xf32>
    %79 = arith.addf %75, %78 : vector<256xf32>
    %c0_18 = arith.constant 0 : index
    %c10 = arith.constant 10 : index
    %80 = memref.load %arg4[%c0_18, %c10] : memref<6x14xf32, #tpu.memory_space<smem>>
    %81 = vector.broadcast %80 : f32 to vector<256xf32>
    %82 = arith.mulf %34, %81 : vector<256xf32>
    %83 = arith.addf %79, %82 : vector<256xf32>
    %c0_19 = arith.constant 0 : index
    %c11 = arith.constant 11 : index
    %84 = memref.load %arg4[%c0_19, %c11] : memref<6x14xf32, #tpu.memory_space<smem>>
    %85 = vector.broadcast %84 : f32 to vector<256xf32>
    %86 = arith.mulf %36, %85 : vector<256xf32>
    %87 = arith.addf %83, %86 : vector<256xf32>
    %c0_20 = arith.constant 0 : index
    %c12 = arith.constant 12 : index
    %88 = memref.load %arg4[%c0_20, %c12] : memref<6x14xf32, #tpu.memory_space<smem>>
    %89 = vector.broadcast %88 : f32 to vector<256xf32>
    %90 = arith.mulf %38, %89 : vector<256xf32>
    %91 = arith.addf %87, %90 : vector<256xf32>
    %c0_21 = arith.constant 0 : index
    %c13 = arith.constant 13 : index
    %92 = memref.load %arg4[%c0_21, %c13] : memref<6x14xf32, #tpu.memory_space<smem>>
    %93 = vector.broadcast %92 : f32 to vector<256xf32>
    %94 = arith.mulf %40, %93 : vector<256xf32>
    %95 = arith.addf %91, %94 : vector<256xf32>
    %c0_22 = arith.constant 0 : index
    %96 = memref.load %arg5[%c0_22] : memref<6xf32, #tpu.memory_space<smem>>
    %97 = vector.broadcast %96 : f32 to vector<256xf32>
    %98 = arith.addf %95, %97 : vector<256xf32>
    %c0_23 = arith.constant 0 : index
    %c0_24 = arith.constant 0 : index
    %99 = vector.load %arg7[%c0_23, %c0_24] : memref<6x256xf32, #tpu.memory_space<vmem>>, vector<1x256xf32>
    %100 = vector.shape_cast %99 : vector<1x256xf32> to vector<256xf32>
    %101 = vector.shape_cast %98 : vector<256xf32> to vector<1x256xf32>
    tpu.vector_store %arg7[%c0_23, %c0_24], %101 {strides = array<i32>} : memref<6x256xf32, #tpu.memory_space<vmem>>, vector<1x256xf32>,
    %c1_25 = arith.constant 1 : index
    %c0_26 = arith.constant 0 : index
    %102 = memref.load %arg4[%c1_25, %c0_26] : memref<6x14xf32, #tpu.memory_space<smem>>
    %103 = vector.broadcast %102 : f32 to vector<256xf32>
    %104 = arith.mulf %14, %103 : vector<256xf32>
    %c1_27 = arith.constant 1 : index
    %c1_28 = arith.constant 1 : index
    %105 = memref.load %arg4[%c1_27, %c1_28] : memref<6x14xf32, #tpu.memory_space<smem>>
    %106 = vector.broadcast %105 : f32 to vector<256xf32>
    %107 = arith.mulf %16, %106 : vector<256xf32>
    %108 = arith.addf %104, %107 : vector<256xf32>
    %c1_29 = arith.constant 1 : index
    %c2_30 = arith.constant 2 : index
    %109 = memref.load %arg4[%c1_29, %c2_30] : memref<6x14xf32, #tpu.memory_space<smem>>
    %110 = vector.broadcast %109 : f32 to vector<256xf32>
    %111 = arith.mulf %18, %110 : vector<256xf32>
    %112 = arith.addf %108, %111 : vector<256xf32>
    %c1_31 = arith.constant 1 : index
    %c3_32 = arith.constant 3 : index
    %113 = memref.load %arg4[%c1_31, %c3_32] : memref<6x14xf32, #tpu.memory_space<smem>>
    %114 = vector.broadcast %113 : f32 to vector<256xf32>
    %115 = arith.mulf %20, %114 : vector<256xf32>
    %116 = arith.addf %112, %115 : vector<256xf32>
    %c1_33 = arith.constant 1 : index
    %c4_34 = arith.constant 4 : index
    %117 = memref.load %arg4[%c1_33, %c4_34] : memref<6x14xf32, #tpu.memory_space<smem>>
    %118 = vector.broadcast %117 : f32 to vector<256xf32>
    %119 = arith.mulf %22, %118 : vector<256xf32>
    %120 = arith.addf %116, %119 : vector<256xf32>
    %c1_35 = arith.constant 1 : index
    %c5_36 = arith.constant 5 : index
    %121 = memref.load %arg4[%c1_35, %c5_36] : memref<6x14xf32, #tpu.memory_space<smem>>
    %122 = vector.broadcast %121 : f32 to vector<256xf32>
    %123 = arith.mulf %24, %122 : vector<256xf32>
    %124 = arith.addf %120, %123 : vector<256xf32>
    %c1_37 = arith.constant 1 : index
    %c6_38 = arith.constant 6 : index
    %125 = memref.load %arg4[%c1_37, %c6_38] : memref<6x14xf32, #tpu.memory_space<smem>>
    %126 = vector.broadcast %125 : f32 to vector<256xf32>
    %127 = arith.mulf %26, %126 : vector<256xf32>
    %128 = arith.addf %124, %127 : vector<256xf32>
    %c1_39 = arith.constant 1 : index
    %c7_40 = arith.constant 7 : index
    %129 = memref.load %arg4[%c1_39, %c7_40] : memref<6x14xf32, #tpu.memory_space<smem>>
    %130 = vector.broadcast %129 : f32 to vector<256xf32>
    %131 = arith.mulf %28, %130 : vector<256xf32>
    %132 = arith.addf %128, %131 : vector<256xf32>
    %c1_41 = arith.constant 1 : index
    %c8_42 = arith.constant 8 : index
    %133 = memref.load %arg4[%c1_41, %c8_42] : memref<6x14xf32, #tpu.memory_space<smem>>
    %134 = vector.broadcast %133 : f32 to vector<256xf32>
    %135 = arith.mulf %30, %134 : vector<256xf32>
    %136 = arith.addf %132, %135 : vector<256xf32>
    %c1_43 = arith.constant 1 : index
    %c9_44 = arith.constant 9 : index
    %137 = memref.load %arg4[%c1_43, %c9_44] : memref<6x14xf32, #tpu.memory_space<smem>>
    %138 = vector.broadcast %137 : f32 to vector<256xf32>
    %139 = arith.mulf %32, %138 : vector<256xf32>
    %140 = arith.addf %136, %139 : vector<256xf32>
    %c1_45 = arith.constant 1 : index
    %c10_46 = arith.constant 10 : index
    %141 = memref.load %arg4[%c1_45, %c10_46] : memref<6x14xf32, #tpu.memory_space<smem>>
    %142 = vector.broadcast %141 : f32 to vector<256xf32>
    %143 = arith.mulf %34, %142 : vector<256xf32>
    %144 = arith.addf %140, %143 : vector<256xf32>
    %c1_47 = arith.constant 1 : index
    %c11_48 = arith.constant 11 : index
    %145 = memref.load %arg4[%c1_47, %c11_48] : memref<6x14xf32, #tpu.memory_space<smem>>
    %146 = vector.broadcast %145 : f32 to vector<256xf32>
    %147 = arith.mulf %36, %146 : vector<256xf32>
    %148 = arith.addf %144, %147 : vector<256xf32>
    %c1_49 = arith.constant 1 : index
    %c12_50 = arith.constant 12 : index
    %149 = memref.load %arg4[%c1_49, %c12_50] : memref<6x14xf32, #tpu.memory_space<smem>>
    %150 = vector.broadcast %149 : f32 to vector<256xf32>
    %151 = arith.mulf %38, %150 : vector<256xf32>
    %152 = arith.addf %148, %151 : vector<256xf32>
    %c1_51 = arith.constant 1 : index
    %c13_52 = arith.constant 13 : index
    %153 = memref.load %arg4[%c1_51, %c13_52] : memref<6x14xf32, #tpu.memory_space<smem>>
    %154 = vector.broadcast %153 : f32 to vector<256xf32>
    %155 = arith.mulf %40, %154 : vector<256xf32>
    %156 = arith.addf %152, %155 : vector<256xf32>
    %c1_53 = arith.constant 1 : index
    %157 = memref.load %arg5[%c1_53] : memref<6xf32, #tpu.memory_space<smem>>
    %158 = vector.broadcast %157 : f32 to vector<256xf32>
    %159 = arith.addf %156, %158 : vector<256xf32>
    %c1_54 = arith.constant 1 : index
    %c0_55 = arith.constant 0 : index
    %160 = vector.load %arg7[%c1_54, %c0_55] : memref<6x256xf32, #tpu.memory_space<vmem>>, vector<1x256xf32>
    %161 = vector.shape_cast %160 : vector<1x256xf32> to vector<256xf32>
    %162 = vector.shape_cast %159 : vector<256xf32> to vector<1x256xf32>
    tpu.vector_store %arg7[%c1_54, %c0_55], %162 {strides = array<i32>} : memref<6x256xf32, #tpu.memory_space<vmem>>, vector<1x256xf32>,
    %c2_56 = arith.constant 2 : index
    %c0_57 = arith.constant 0 : index
    %163 = memref.load %arg4[%c2_56, %c0_57] : memref<6x14xf32, #tpu.memory_space<smem>>
    %164 = vector.broadcast %163 : f32 to vector<256xf32>
    %165 = arith.mulf %14, %164 : vector<256xf32>
    %c2_58 = arith.constant 2 : index
    %c1_59 = arith.constant 1 : index
    %166 = memref.load %arg4[%c2_58, %c1_59] : memref<6x14xf32, #tpu.memory_space<smem>>
    %167 = vector.broadcast %166 : f32 to vector<256xf32>
    %168 = arith.mulf %16, %167 : vector<256xf32>
    %169 = arith.addf %165, %168 : vector<256xf32>
    %c2_60 = arith.constant 2 : index
    %c2_61 = arith.constant 2 : index
    %170 = memref.load %arg4[%c2_60, %c2_61] : memref<6x14xf32, #tpu.memory_space<smem>>
    %171 = vector.broadcast %170 : f32 to vector<256xf32>
    %172 = arith.mulf %18, %171 : vector<256xf32>
    %173 = arith.addf %169, %172 : vector<256xf32>
    %c2_62 = arith.constant 2 : index
    %c3_63 = arith.constant 3 : index
    %174 = memref.load %arg4[%c2_62, %c3_63] : memref<6x14xf32, #tpu.memory_space<smem>>
    %175 = vector.broadcast %174 : f32 to vector<256xf32>
    %176 = arith.mulf %20, %175 : vector<256xf32>
    %177 = arith.addf %173, %176 : vector<256xf32>
    %c2_64 = arith.constant 2 : index
    %c4_65 = arith.constant 4 : index
    %178 = memref.load %arg4[%c2_64, %c4_65] : memref<6x14xf32, #tpu.memory_space<smem>>
    %179 = vector.broadcast %178 : f32 to vector<256xf32>
    %180 = arith.mulf %22, %179 : vector<256xf32>
    %181 = arith.addf %177, %180 : vector<256xf32>
    %c2_66 = arith.constant 2 : index
    %c5_67 = arith.constant 5 : index
    %182 = memref.load %arg4[%c2_66, %c5_67] : memref<6x14xf32, #tpu.memory_space<smem>>
    %183 = vector.broadcast %182 : f32 to vector<256xf32>
    %184 = arith.mulf %24, %183 : vector<256xf32>
    %185 = arith.addf %181, %184 : vector<256xf32>
    %c2_68 = arith.constant 2 : index
    %c6_69 = arith.constant 6 : index
    %186 = memref.load %arg4[%c2_68, %c6_69] : memref<6x14xf32, #tpu.memory_space<smem>>
    %187 = vector.broadcast %186 : f32 to vector<256xf32>
    %188 = arith.mulf %26, %187 : vector<256xf32>
    %189 = arith.addf %185, %188 : vector<256xf32>
    %c2_70 = arith.constant 2 : index
    %c7_71 = arith.constant 7 : index
    %190 = memref.load %arg4[%c2_70, %c7_71] : memref<6x14xf32, #tpu.memory_space<smem>>
    %191 = vector.broadcast %190 : f32 to vector<256xf32>
    %192 = arith.mulf %28, %191 : vector<256xf32>
    %193 = arith.addf %189, %192 : vector<256xf32>
    %c2_72 = arith.constant 2 : index
    %c8_73 = arith.constant 8 : index
    %194 = memref.load %arg4[%c2_72, %c8_73] : memref<6x14xf32, #tpu.memory_space<smem>>
    %195 = vector.broadcast %194 : f32 to vector<256xf32>
    %196 = arith.mulf %30, %195 : vector<256xf32>
    %197 = arith.addf %193, %196 : vector<256xf32>
    %c2_74 = arith.constant 2 : index
    %c9_75 = arith.constant 9 : index
    %198 = memref.load %arg4[%c2_74, %c9_75] : memref<6x14xf32, #tpu.memory_space<smem>>
    %199 = vector.broadcast %198 : f32 to vector<256xf32>
    %200 = arith.mulf %32, %199 : vector<256xf32>
    %201 = arith.addf %197, %200 : vector<256xf32>
    %c2_76 = arith.constant 2 : index
    %c10_77 = arith.constant 10 : index
    %202 = memref.load %arg4[%c2_76, %c10_77] : memref<6x14xf32, #tpu.memory_space<smem>>
    %203 = vector.broadcast %202 : f32 to vector<256xf32>
    %204 = arith.mulf %34, %203 : vector<256xf32>
    %205 = arith.addf %201, %204 : vector<256xf32>
    %c2_78 = arith.constant 2 : index
    %c11_79 = arith.constant 11 : index
    %206 = memref.load %arg4[%c2_78, %c11_79] : memref<6x14xf32, #tpu.memory_space<smem>>
    %207 = vector.broadcast %206 : f32 to vector<256xf32>
    %208 = arith.mulf %36, %207 : vector<256xf32>
    %209 = arith.addf %205, %208 : vector<256xf32>
    %c2_80 = arith.constant 2 : index
    %c12_81 = arith.constant 12 : index
    %210 = memref.load %arg4[%c2_80, %c12_81] : memref<6x14xf32, #tpu.memory_space<smem>>
    %211 = vector.broadcast %210 : f32 to vector<256xf32>
    %212 = arith.mulf %38, %211 : vector<256xf32>
    %213 = arith.addf %209, %212 : vector<256xf32>
    %c2_82 = arith.constant 2 : index
    %c13_83 = arith.constant 13 : index
    %214 = memref.load %arg4[%c2_82, %c13_83] : memref<6x14xf32, #tpu.memory_space<smem>>
    %215 = vector.broadcast %214 : f32 to vector<256xf32>
    %216 = arith.mulf %40, %215 : vector<256xf32>
    %217 = arith.addf %213, %216 : vector<256xf32>
    %c2_84 = arith.constant 2 : index
    %218 = memref.load %arg5[%c2_84] : memref<6xf32, #tpu.memory_space<smem>>
    %219 = vector.broadcast %218 : f32 to vector<256xf32>
    %220 = arith.addf %217, %219 : vector<256xf32>
    %c2_85 = arith.constant 2 : index
    %c0_86 = arith.constant 0 : index
    %221 = vector.load %arg7[%c2_85, %c0_86] : memref<6x256xf32, #tpu.memory_space<vmem>>, vector<1x256xf32>
    %222 = vector.shape_cast %221 : vector<1x256xf32> to vector<256xf32>
    %223 = vector.shape_cast %220 : vector<256xf32> to vector<1x256xf32>
    tpu.vector_store %arg7[%c2_85, %c0_86], %223 {strides = array<i32>} : memref<6x256xf32, #tpu.memory_space<vmem>>, vector<1x256xf32>,
    %c3_87 = arith.constant 3 : index
    %c0_88 = arith.constant 0 : index
    %224 = memref.load %arg4[%c3_87, %c0_88] : memref<6x14xf32, #tpu.memory_space<smem>>
    %225 = vector.broadcast %224 : f32 to vector<256xf32>
    %226 = arith.mulf %14, %225 : vector<256xf32>
    %c3_89 = arith.constant 3 : index
    %c1_90 = arith.constant 1 : index
    %227 = memref.load %arg4[%c3_89, %c1_90] : memref<6x14xf32, #tpu.memory_space<smem>>
    %228 = vector.broadcast %227 : f32 to vector<256xf32>
    %229 = arith.mulf %16, %228 : vector<256xf32>
    %230 = arith.addf %226, %229 : vector<256xf32>
    %c3_91 = arith.constant 3 : index
    %c2_92 = arith.constant 2 : index
    %231 = memref.load %arg4[%c3_91, %c2_92] : memref<6x14xf32, #tpu.memory_space<smem>>
    %232 = vector.broadcast %231 : f32 to vector<256xf32>
    %233 = arith.mulf %18, %232 : vector<256xf32>
    %234 = arith.addf %230, %233 : vector<256xf32>
    %c3_93 = arith.constant 3 : index
    %c3_94 = arith.constant 3 : index
    %235 = memref.load %arg4[%c3_93, %c3_94] : memref<6x14xf32, #tpu.memory_space<smem>>
    %236 = vector.broadcast %235 : f32 to vector<256xf32>
    %237 = arith.mulf %20, %236 : vector<256xf32>
    %238 = arith.addf %234, %237 : vector<256xf32>
    %c3_95 = arith.constant 3 : index
    %c4_96 = arith.constant 4 : index
    %239 = memref.load %arg4[%c3_95, %c4_96] : memref<6x14xf32, #tpu.memory_space<smem>>
    %240 = vector.broadcast %239 : f32 to vector<256xf32>
    %241 = arith.mulf %22, %240 : vector<256xf32>
    %242 = arith.addf %238, %241 : vector<256xf32>
    %c3_97 = arith.constant 3 : index
    %c5_98 = arith.constant 5 : index
    %243 = memref.load %arg4[%c3_97, %c5_98] : memref<6x14xf32, #tpu.memory_space<smem>>
    %244 = vector.broadcast %243 : f32 to vector<256xf32>
    %245 = arith.mulf %24, %244 : vector<256xf32>
    %246 = arith.addf %242, %245 : vector<256xf32>
    %c3_99 = arith.constant 3 : index
    %c6_100 = arith.constant 6 : index
    %247 = memref.load %arg4[%c3_99, %c6_100] : memref<6x14xf32, #tpu.memory_space<smem>>
    %248 = vector.broadcast %247 : f32 to vector<256xf32>
    %249 = arith.mulf %26, %248 : vector<256xf32>
    %250 = arith.addf %246, %249 : vector<256xf32>
    %c3_101 = arith.constant 3 : index
    %c7_102 = arith.constant 7 : index
    %251 = memref.load %arg4[%c3_101, %c7_102] : memref<6x14xf32, #tpu.memory_space<smem>>
    %252 = vector.broadcast %251 : f32 to vector<256xf32>
    %253 = arith.mulf %28, %252 : vector<256xf32>
    %254 = arith.addf %250, %253 : vector<256xf32>
    %c3_103 = arith.constant 3 : index
    %c8_104 = arith.constant 8 : index
    %255 = memref.load %arg4[%c3_103, %c8_104] : memref<6x14xf32, #tpu.memory_space<smem>>
    %256 = vector.broadcast %255 : f32 to vector<256xf32>
    %257 = arith.mulf %30, %256 : vector<256xf32>
    %258 = arith.addf %254, %257 : vector<256xf32>
    %c3_105 = arith.constant 3 : index
    %c9_106 = arith.constant 9 : index
    %259 = memref.load %arg4[%c3_105, %c9_106] : memref<6x14xf32, #tpu.memory_space<smem>>
    %260 = vector.broadcast %259 : f32 to vector<256xf32>
    %261 = arith.mulf %32, %260 : vector<256xf32>
    %262 = arith.addf %258, %261 : vector<256xf32>
    %c3_107 = arith.constant 3 : index
    %c10_108 = arith.constant 10 : index
    %263 = memref.load %arg4[%c3_107, %c10_108] : memref<6x14xf32, #tpu.memory_space<smem>>
    %264 = vector.broadcast %263 : f32 to vector<256xf32>
    %265 = arith.mulf %34, %264 : vector<256xf32>
    %266 = arith.addf %262, %265 : vector<256xf32>
    %c3_109 = arith.constant 3 : index
    %c11_110 = arith.constant 11 : index
    %267 = memref.load %arg4[%c3_109, %c11_110] : memref<6x14xf32, #tpu.memory_space<smem>>
    %268 = vector.broadcast %267 : f32 to vector<256xf32>
    %269 = arith.mulf %36, %268 : vector<256xf32>
    %270 = arith.addf %266, %269 : vector<256xf32>
    %c3_111 = arith.constant 3 : index
    %c12_112 = arith.constant 12 : index
    %271 = memref.load %arg4[%c3_111, %c12_112] : memref<6x14xf32, #tpu.memory_space<smem>>
    %272 = vector.broadcast %271 : f32 to vector<256xf32>
    %273 = arith.mulf %38, %272 : vector<256xf32>
    %274 = arith.addf %270, %273 : vector<256xf32>
    %c3_113 = arith.constant 3 : index
    %c13_114 = arith.constant 13 : index
    %275 = memref.load %arg4[%c3_113, %c13_114] : memref<6x14xf32, #tpu.memory_space<smem>>
    %276 = vector.broadcast %275 : f32 to vector<256xf32>
    %277 = arith.mulf %40, %276 : vector<256xf32>
    %278 = arith.addf %274, %277 : vector<256xf32>
    %c3_115 = arith.constant 3 : index
    %279 = memref.load %arg5[%c3_115] : memref<6xf32, #tpu.memory_space<smem>>
    %280 = vector.broadcast %279 : f32 to vector<256xf32>
    %281 = arith.addf %278, %280 : vector<256xf32>
    %c3_116 = arith.constant 3 : index
    %c0_117 = arith.constant 0 : index
    %282 = vector.load %arg7[%c3_116, %c0_117] : memref<6x256xf32, #tpu.memory_space<vmem>>, vector<1x256xf32>
    %283 = vector.shape_cast %282 : vector<1x256xf32> to vector<256xf32>
    %284 = vector.shape_cast %281 : vector<256xf32> to vector<1x256xf32>
    tpu.vector_store %arg7[%c3_116, %c0_117], %284 {strides = array<i32>} : memref<6x256xf32, #tpu.memory_space<vmem>>, vector<1x256xf32>,
    %c4_118 = arith.constant 4 : index
    %c0_119 = arith.constant 0 : index
    %285 = memref.load %arg4[%c4_118, %c0_119] : memref<6x14xf32, #tpu.memory_space<smem>>
    %286 = vector.broadcast %285 : f32 to vector<256xf32>
    %287 = arith.mulf %14, %286 : vector<256xf32>
    %c4_120 = arith.constant 4 : index
    %c1_121 = arith.constant 1 : index
    %288 = memref.load %arg4[%c4_120, %c1_121] : memref<6x14xf32, #tpu.memory_space<smem>>
    %289 = vector.broadcast %288 : f32 to vector<256xf32>
    %290 = arith.mulf %16, %289 : vector<256xf32>
    %291 = arith.addf %287, %290 : vector<256xf32>
    %c4_122 = arith.constant 4 : index
    %c2_123 = arith.constant 2 : index
    %292 = memref.load %arg4[%c4_122, %c2_123] : memref<6x14xf32, #tpu.memory_space<smem>>
    %293 = vector.broadcast %292 : f32 to vector<256xf32>
    %294 = arith.mulf %18, %293 : vector<256xf32>
    %295 = arith.addf %291, %294 : vector<256xf32>
    %c4_124 = arith.constant 4 : index
    %c3_125 = arith.constant 3 : index
    %296 = memref.load %arg4[%c4_124, %c3_125] : memref<6x14xf32, #tpu.memory_space<smem>>
    %297 = vector.broadcast %296 : f32 to vector<256xf32>
    %298 = arith.mulf %20, %297 : vector<256xf32>
    %299 = arith.addf %295, %298 : vector<256xf32>
    %c4_126 = arith.constant 4 : index
    %c4_127 = arith.constant 4 : index
    %300 = memref.load %arg4[%c4_126, %c4_127] : memref<6x14xf32, #tpu.memory_space<smem>>
    %301 = vector.broadcast %300 : f32 to vector<256xf32>
    %302 = arith.mulf %22, %301 : vector<256xf32>
    %303 = arith.addf %299, %302 : vector<256xf32>
    %c4_128 = arith.constant 4 : index
    %c5_129 = arith.constant 5 : index
    %304 = memref.load %arg4[%c4_128, %c5_129] : memref<6x14xf32, #tpu.memory_space<smem>>
    %305 = vector.broadcast %304 : f32 to vector<256xf32>
    %306 = arith.mulf %24, %305 : vector<256xf32>
    %307 = arith.addf %303, %306 : vector<256xf32>
    %c4_130 = arith.constant 4 : index
    %c6_131 = arith.constant 6 : index
    %308 = memref.load %arg4[%c4_130, %c6_131] : memref<6x14xf32, #tpu.memory_space<smem>>
    %309 = vector.broadcast %308 : f32 to vector<256xf32>
    %310 = arith.mulf %26, %309 : vector<256xf32>
    %311 = arith.addf %307, %310 : vector<256xf32>
    %c4_132 = arith.constant 4 : index
    %c7_133 = arith.constant 7 : index
    %312 = memref.load %arg4[%c4_132, %c7_133] : memref<6x14xf32, #tpu.memory_space<smem>>
    %313 = vector.broadcast %312 : f32 to vector<256xf32>
    %314 = arith.mulf %28, %313 : vector<256xf32>
    %315 = arith.addf %311, %314 : vector<256xf32>
    %c4_134 = arith.constant 4 : index
    %c8_135 = arith.constant 8 : index
    %316 = memref.load %arg4[%c4_134, %c8_135] : memref<6x14xf32, #tpu.memory_space<smem>>
    %317 = vector.broadcast %316 : f32 to vector<256xf32>
    %318 = arith.mulf %30, %317 : vector<256xf32>
    %319 = arith.addf %315, %318 : vector<256xf32>
    %c4_136 = arith.constant 4 : index
    %c9_137 = arith.constant 9 : index
    %320 = memref.load %arg4[%c4_136, %c9_137] : memref<6x14xf32, #tpu.memory_space<smem>>
    %321 = vector.broadcast %320 : f32 to vector<256xf32>
    %322 = arith.mulf %32, %321 : vector<256xf32>
    %323 = arith.addf %319, %322 : vector<256xf32>
    %c4_138 = arith.constant 4 : index
    %c10_139 = arith.constant 10 : index
    %324 = memref.load %arg4[%c4_138, %c10_139] : memref<6x14xf32, #tpu.memory_space<smem>>
    %325 = vector.broadcast %324 : f32 to vector<256xf32>
    %326 = arith.mulf %34, %325 : vector<256xf32>
    %327 = arith.addf %323, %326 : vector<256xf32>
    %c4_140 = arith.constant 4 : index
    %c11_141 = arith.constant 11 : index
    %328 = memref.load %arg4[%c4_140, %c11_141] : memref<6x14xf32, #tpu.memory_space<smem>>
    %329 = vector.broadcast %328 : f32 to vector<256xf32>
    %330 = arith.mulf %36, %329 : vector<256xf32>
    %331 = arith.addf %327, %330 : vector<256xf32>
    %c4_142 = arith.constant 4 : index
    %c12_143 = arith.constant 12 : index
    %332 = memref.load %arg4[%c4_142, %c12_143] : memref<6x14xf32, #tpu.memory_space<smem>>
    %333 = vector.broadcast %332 : f32 to vector<256xf32>
    %334 = arith.mulf %38, %333 : vector<256xf32>
    %335 = arith.addf %331, %334 : vector<256xf32>
    %c4_144 = arith.constant 4 : index
    %c13_145 = arith.constant 13 : index
    %336 = memref.load %arg4[%c4_144, %c13_145] : memref<6x14xf32, #tpu.memory_space<smem>>
    %337 = vector.broadcast %336 : f32 to vector<256xf32>
    %338 = arith.mulf %40, %337 : vector<256xf32>
    %339 = arith.addf %335, %338 : vector<256xf32>
    %c4_146 = arith.constant 4 : index
    %340 = memref.load %arg5[%c4_146] : memref<6xf32, #tpu.memory_space<smem>>
    %341 = vector.broadcast %340 : f32 to vector<256xf32>
    %342 = arith.addf %339, %341 : vector<256xf32>
    %c4_147 = arith.constant 4 : index
    %c0_148 = arith.constant 0 : index
    %343 = vector.load %arg7[%c4_147, %c0_148] : memref<6x256xf32, #tpu.memory_space<vmem>>, vector<1x256xf32>
    %344 = vector.shape_cast %343 : vector<1x256xf32> to vector<256xf32>
    %345 = vector.shape_cast %342 : vector<256xf32> to vector<1x256xf32>
    tpu.vector_store %arg7[%c4_147, %c0_148], %345 {strides = array<i32>} : memref<6x256xf32, #tpu.memory_space<vmem>>, vector<1x256xf32>,
    %c5_149 = arith.constant 5 : index
    %c0_150 = arith.constant 0 : index
    %346 = memref.load %arg4[%c5_149, %c0_150] : memref<6x14xf32, #tpu.memory_space<smem>>
    %347 = vector.broadcast %346 : f32 to vector<256xf32>
    %348 = arith.mulf %14, %347 : vector<256xf32>
    %c5_151 = arith.constant 5 : index
    %c1_152 = arith.constant 1 : index
    %349 = memref.load %arg4[%c5_151, %c1_152] : memref<6x14xf32, #tpu.memory_space<smem>>
    %350 = vector.broadcast %349 : f32 to vector<256xf32>
    %351 = arith.mulf %16, %350 : vector<256xf32>
    %352 = arith.addf %348, %351 : vector<256xf32>
    %c5_153 = arith.constant 5 : index
    %c2_154 = arith.constant 2 : index
    %353 = memref.load %arg4[%c5_153, %c2_154] : memref<6x14xf32, #tpu.memory_space<smem>>
    %354 = vector.broadcast %353 : f32 to vector<256xf32>
    %355 = arith.mulf %18, %354 : vector<256xf32>
    %356 = arith.addf %352, %355 : vector<256xf32>
    %c5_155 = arith.constant 5 : index
    %c3_156 = arith.constant 3 : index
    %357 = memref.load %arg4[%c5_155, %c3_156] : memref<6x14xf32, #tpu.memory_space<smem>>
    %358 = vector.broadcast %357 : f32 to vector<256xf32>
    %359 = arith.mulf %20, %358 : vector<256xf32>
    %360 = arith.addf %356, %359 : vector<256xf32>
    %c5_157 = arith.constant 5 : index
    %c4_158 = arith.constant 4 : index
    %361 = memref.load %arg4[%c5_157, %c4_158] : memref<6x14xf32, #tpu.memory_space<smem>>
    %362 = vector.broadcast %361 : f32 to vector<256xf32>
    %363 = arith.mulf %22, %362 : vector<256xf32>
    %364 = arith.addf %360, %363 : vector<256xf32>
    %c5_159 = arith.constant 5 : index
    %c5_160 = arith.constant 5 : index
    %365 = memref.load %arg4[%c5_159, %c5_160] : memref<6x14xf32, #tpu.memory_space<smem>>
    %366 = vector.broadcast %365 : f32 to vector<256xf32>
    %367 = arith.mulf %24, %366 : vector<256xf32>
    %368 = arith.addf %364, %367 : vector<256xf32>
    %c5_161 = arith.constant 5 : index
    %c6_162 = arith.constant 6 : index
    %369 = memref.load %arg4[%c5_161, %c6_162] : memref<6x14xf32, #tpu.memory_space<smem>>
    %370 = vector.broadcast %369 : f32 to vector<256xf32>
    %371 = arith.mulf %26, %370 : vector<256xf32>
    %372 = arith.addf %368, %371 : vector<256xf32>
    %c5_163 = arith.constant 5 : index
    %c7_164 = arith.constant 7 : index
    %373 = memref.load %arg4[%c5_163, %c7_164] : memref<6x14xf32, #tpu.memory_space<smem>>
    %374 = vector.broadcast %373 : f32 to vector<256xf32>
    %375 = arith.mulf %28, %374 : vector<256xf32>
    %376 = arith.addf %372, %375 : vector<256xf32>
    %c5_165 = arith.constant 5 : index
    %c8_166 = arith.constant 8 : index
    %377 = memref.load %arg4[%c5_165, %c8_166] : memref<6x14xf32, #tpu.memory_space<smem>>
    %378 = vector.broadcast %377 : f32 to vector<256xf32>
    %379 = arith.mulf %30, %378 : vector<256xf32>
    %380 = arith.addf %376, %379 : vector<256xf32>
    %c5_167 = arith.constant 5 : index
    %c9_168 = arith.constant 9 : index
    %381 = memref.load %arg4[%c5_167, %c9_168] : memref<6x14xf32, #tpu.memory_space<smem>>
    %382 = vector.broadcast %381 : f32 to vector<256xf32>
    %383 = arith.mulf %32, %382 : vector<256xf32>
    %384 = arith.addf %380, %383 : vector<256xf32>
    %c5_169 = arith.constant 5 : index
    %c10_170 = arith.constant 10 : index
    %385 = memref.load %arg4[%c5_169, %c10_170] : memref<6x14xf32, #tpu.memory_space<smem>>
    %386 = vector.broadcast %385 : f32 to vector<256xf32>
    %387 = arith.mulf %34, %386 : vector<256xf32>
    %388 = arith.addf %384, %387 : vector<256xf32>
    %c5_171 = arith.constant 5 : index
    %c11_172 = arith.constant 11 : index
    %389 = memref.load %arg4[%c5_171, %c11_172] : memref<6x14xf32, #tpu.memory_space<smem>>
    %390 = vector.broadcast %389 : f32 to vector<256xf32>
    %391 = arith.mulf %36, %390 : vector<256xf32>
    %392 = arith.addf %388, %391 : vector<256xf32>
    %c5_173 = arith.constant 5 : index
    %c12_174 = arith.constant 12 : index
    %393 = memref.load %arg4[%c5_173, %c12_174] : memref<6x14xf32, #tpu.memory_space<smem>>
    %394 = vector.broadcast %393 : f32 to vector<256xf32>
    %395 = arith.mulf %38, %394 : vector<256xf32>
    %396 = arith.addf %392, %395 : vector<256xf32>
    %c5_175 = arith.constant 5 : index
    %c13_176 = arith.constant 13 : index
    %397 = memref.load %arg4[%c5_175, %c13_176] : memref<6x14xf32, #tpu.memory_space<smem>>
    %398 = vector.broadcast %397 : f32 to vector<256xf32>
    %399 = arith.mulf %40, %398 : vector<256xf32>
    %400 = arith.addf %396, %399 : vector<256xf32>
    %c5_177 = arith.constant 5 : index
    %401 = memref.load %arg5[%c5_177] : memref<6xf32, #tpu.memory_space<smem>>
    %402 = vector.broadcast %401 : f32 to vector<256xf32>
    %403 = arith.addf %400, %402 : vector<256xf32>
    %c5_178 = arith.constant 5 : index
    %c0_179 = arith.constant 0 : index
    %404 = vector.load %arg7[%c5_178, %c0_179] : memref<6x256xf32, #tpu.memory_space<vmem>>, vector<1x256xf32>
    %405 = vector.shape_cast %404 : vector<1x256xf32> to vector<256xf32>
    %406 = vector.shape_cast %403 : vector<256xf32> to vector<1x256xf32>
    tpu.vector_store %arg7[%c5_178, %c0_179], %406 {strides = array<i32>} : memref<6x256xf32, #tpu.memory_space<vmem>>, vector<1x256xf32>,
    return
  }
  func.func @transform_0(%arg0: i32) -> (i32, i32) {
    %c0_i32 = arith.constant 0 : i32
    %c0_i32_0 = arith.constant 0 : i32
    return %c0_i32, %arg0 : i32, i32
  }
  func.func @transform_1(%arg0: i32) -> (i32, i32) {
    %c0_i32 = arith.constant 0 : i32
    %c0_i32_0 = arith.constant 0 : i32
    return %c0_i32, %arg0 : i32, i32
  }
  func.func @transform_2(%arg0: i32) -> (i32, i32) {
    %c0_i32 = arith.constant 0 : i32
    %c0_i32_0 = arith.constant 0 : i32
    %c0_i32_1 = arith.constant 0 : i32
    return %c0_i32, %c0_i32_0 : i32, i32
  }
  func.func @transform_3(%arg0: i32) -> (i32, i32) {
    %c0_i32 = arith.constant 0 : i32
    %c0_i32_0 = arith.constant 0 : i32
    %c0_i32_1 = arith.constant 0 : i32
    return %c0_i32, %c0_i32_0 : i32, i32
  }
  func.func @transform_4(%arg0: i32) -> i32 {
    %c0_i32 = arith.constant 0 : i32
    %c0_i32_0 = arith.constant 0 : i32
    return %c0_i32 : i32
  }
  func.func @transform_5(%arg0: i32) -> (i32, i32) {
    %c0_i32 = arith.constant 0 : i32
    %c0_i32_0 = arith.constant 0 : i32
    return %c0_i32, %arg0 : i32, i32
  }
  func.func @transform_6(%arg0: i32) -> (i32, i32) {
    %c0_i32 = arith.constant 0 : i32
    %c0_i32_0 = arith.constant 0 : i32
    return %c0_i32, %arg0 : i32, i32
  }
}

</mosaic_0001>

<bundles_post_ra>
// kernel: tpu_custom_call.1
= control target key start
LH: loop header
LB: loop body
LE: loop exit
PB: predicated region body
PF: predicated region fallthrough
CT: control target
= control target key end

     0   :  { %s3756_s0 = inlined_call_operand.hbm [shape: f32[7,512], index: 0, kind: input, shape index: {}]   ;;  %s3757_s1 = inlined_call_operand.hbm [shape: f32[7,512], index: 1, kind: input, shape index: {}]   ;;  %s3758_s2 = inlined_call_operand.vmem [shape: f32[7,1], index: 2, kind: input, shape index: {}]   ;;  %s3759_s3 = inlined_call_operand.vmem [shape: f32[6,14], index: 3, kind: input, shape index: {}]   ;;  %s3760_s4 = inlined_call_operand.vmem [shape: f32[6], index: 4, kind: input, shape index: {}]   ;;  %s3761_s5 = inlined_call_operand.hbm [shape: f32[7,512], index: 5, kind: output, shape index: {0}]   ;;  %s3762_s6 = inlined_call_operand.hbm [shape: f32[6,512], index: 6, kind: output, shape index: {1}]  }
   0x1   :  { %3770 = sst [smem:[#allocation27_spill]] %s3756_s0 }
   0x2   :  { %3771 = sst [smem:[#allocation28_spill]] %s3757_s1 }
   0x3   :  { %3772 = sst [smem:[#allocation29_spill]] %s3758_s2 }
   0x4   :  { %3773 = sst [smem:[#allocation30_spill]] %s3759_s3 }
   0x5   :  { %3774 = sst [smem:[#allocation31_spill]] %s3760_s4 }
   0x6   :  { %12 = vsyncpa [#allocation3], 0 }
   0x7   :  { %14 = vsyncpa [#allocation3 + $0x1], 0 }
   0x8   :  { %15 = vsyncpa [#allocation7], 0 }
   0x9   :  { %17 = vsyncpa [#allocation7 + $0x1], 0 }
   0xa   :  { %18 = vsyncpa [#allocation5], 0 }
   0xb   :  { %19 = vsyncpa [#allocation10], 0 }
   0xc   :  { %20 = vsyncpa [#allocation4], 0 }
   0xd   :  { %22 = vsyncpa [#allocation4 + $0x1], 0 }
   0xe   :  { %23 = vsyncpa [#allocation13], 0 }
   0xf   :  { %25 = vsyncpa [#allocation13 + $0x1], 0  ;;  %s2645_s21 = smov 0   ;;  %s2647_s22 = smov 0  }
  0x10   :  { %s2649_s23 = smov 0   ;;  %s2651_s24 = smov 0  }
  0x11 LB: > { %3775 = sst [smem:[#allocation20_spill]] %s2587_s21  ;;  %s2666_s25 = sadd.s32 4294967295, %s2599_s24   ;;  %s2599_s24 = sphi %s2651_s24, %s3800_s24   ;;  %s2595_s23 = sphi %s2649_s23, %s3803_s23   ;;  %s2591_s22 = sphi %s2647_s22, %s3802_s22   ;;  %s2587_s21 = sphi %s2645_s21, %s3801_s21  }
  0x12   : > { %3776 = sst [smem:[#allocation21_spill]] %s2591_s22  ;;  %s2179_s26 = sadd.s32 4294967294, %s2599_s24  }
  0x13   : > { %3777 = sst [smem:[#allocation22_spill]] %s2595_s23  ;;  %p51_p0 = scmp.ne.s32.totalorder %s2591_s22, %s2587_s21 }
  0x14   : > { %3778 = sst [smem:[#allocation23_spill]] %s2599_s24  ;;  %p52_p1 = scmp.eq.s32.totalorder %s2666_s25, 0 }
  0x15   : > { %p164_p2 = scmp.eq.s32.totalorder %s2666_s25, 1  ;;  %p170_p3 = scmp.eq.s32.totalorder %s2179_s26, 1 }
  0x16   : > { %p2675_p4 = por %p52_p1, %p51_p0  ;;  %p2180_p5 = scmp.ge.s32.totalorder %s2599_s24, 1 }
  0x17   : > { %p2680_p6 = por %p170_p3, %p51_p0  ;;  %p203_p7 = scmp.lt.s32.totalorder %s2599_s24, 3 }
  0x18   : > { %s3782_s3 = sld [smem:[#allocation30_spill]]  ;;  %s2701_s12 = sadd.s32 1, %s2599_s24  }
  0x19   : > { %s3780_s28 = scalar_select %p2680_p6, 1, 0 }
  0x1a   : > { %p2688_p8 = pnand %p2180_p5, %p203_p7  ;;  %s3784_s4 = sld [smem:[#allocation31_spill]] }
  0x1b   : > { %3781 = sst [smem:[#allocation24_spill]] %s3780_s28  ;;  %s35_s13 = ssub.s32 %s2599_s24, %s2701_s12 }
  0x1c   : > { %p2330_p10 = pneg %p2688_p8  ;;  %3785 = sst [smem:[#allocation25_spill]] %s2701_s12 }
  0x1d   : > { %s2601_s14 = smov [#allocation8]   ;;  %s2602_s15 = smov [#allocation9]  }
  0x1e   : > { %s218_s7 = sshll.u32 %s3782_s3, 4  ;;  %p2331_p11 = pnand %p2330_p10, %p52_p1  ;;  %s219_s7 = int_to_ptr.vmem [resolvable:$true] %s218_s7 }
  0x1f   : > { %p36_p12 = scmp.eq.s32.totalorder %s35_s13, 0  ;;  %s38_s16 = sadd.s32 1, %s2595_s23 }
  0x20   : > { %s228_s11 = sshll.u32 %s3784_s4, 4  ;;  %p45_p13 = scmp.ne.s32.totalorder %s2595_s23, %s2591_s22  ;;  %s229_s11 = int_to_ptr.vmem [resolvable:$true] %s228_s11 }
  0x21   : > { %2333 = dma.vmem_to_smem (!%p2331_p11), %s219_s7, 128, %s2601_s14, [#allocation5]  }
  0x22   : > { %2336 = dma.vmem_to_smem (!%p2331_p11), %s229_s11, 16, %s2602_s15, [#allocation10]  }
  0x23   : > { %p46_p0 = scmp.eq.s32.totalorder %s2599_s24, 0  ;;  %p2714_p5 = por %p164_p2, %p45_p13 }
  0x24   : > { %s2710_s17 = scalar_select %p36_p12, %s2595_s23, %s38_s16  }
  0x25   : > { %p47_p3 = por %p46_p0, %p45_p13  ;;  %p2353_p7 = scmp.lt.s32.totalorder %s2599_s24, 2 }
  0x26   : > { %3786 = sst [smem:[#allocation26_spill]] %s2710_s17  ;;  %s2720_s19 = sand.u32 1, %s2595_s23  }
  0x27   : > { %s2184_s20 = sshll.u32 %s2720_s19, 4  ;;  %s2310_s26 = sshll.u32 %s2599_s24, 4 }
  0x28   : > { %s3788_s0 = sld [smem:[#allocation27_spill]]  ;;  %s243_s9 = scalar_lea.vmem [#allocation2], %s2184_s20 }
  0x29   : > { %s252_s10 = sshll.u32 %s243_s9, 4  ;;  %p2727_p2 = pnand %p2353_p7, %p47_p3  ;;  %s253_s10 = int_to_ptr.vmem [resolvable:$true] %s252_s10 }
  0x2a   : > { %s3790_s1 = sld [smem:[#allocation28_spill]]  ;;  %s240_s3 = scalar_lea.sflag [#allocation3], %s2720_s19 }
  0x2b   : > { %p2433_p11 = pneg %p2727_p2 }
  0x2e   : > { %s248_s7 = scalar_lea.hbm %s3788_s0, %s2310_s26  ;;  %s2436_s9 = scalar_lea.hbm %s3788_s0, 32 }
  0x2f   : > { %s250_s11 = sshll.u32 %s248_s7, 4  ;;  %s251_s11 = int_to_ptr.hbm [resolvable:$true] %s250_s11 }
  0x30   : > { %s268_s16 = scalar_lea.hbm %s3790_s1, %s2310_s26  ;;  %s2429_s4 = sshra.s32 %s251_s11, 4  ;;  %s2430_s4 = int_to_ptr.hbm [resolvable:$true] %s2429_s4 }
  0x31   : > { %s2431_s29 = scalar_lea.hbm %s2430_s4, 16  ;;  %p2437_p0 = scmp.lt.s32.totalorder %s2430_s4, %s3788_s0 }
  0x32   : > { %p2432_p10 = scmp.ne.s32.totalorder %s2430_s4, %s2431_s29  ;;  %p2438_p3 = scmp.lt.s32.totalorder %s2436_s9, %s2431_s29 }
  0x34   : > { %p2434_p12 = pnand %p2433_p11, %p2432_p10  ;;  %p2439_p7 = por %p2438_p3, %p2437_p0 }
  0x36   : > { %p2435_p13 = pneg %p2434_p12 }
  0x38   : > { %p2440_p9 = pnand %p2439_p7, %p2435_p13 }
  0x3a   : > { %2443 = shalt.err (!%p2440_p9)
}
  0x3b   : > { %2340 = dma.hbm_to_vmem [thread:$0]  (!%p2727_p2), %s251_s11, 256, %s253_s10, %s240_s3  }
  0x3c   : > { %s270_s26 = sshll.u32 %s268_s16, 4  ;;  %s263_s15 = scalar_lea.vmem [#allocation6], %s2184_s20  ;;  %s271_s26 = int_to_ptr.hbm [resolvable:$true] %s270_s26 }
  0x3d   : > { %s272_s23 = sshll.u32 %s263_s15, 4  ;;  %s260_s30 = scalar_lea.sflag [#allocation7], %s2720_s19  ;;  %s273_s23 = int_to_ptr.vmem [resolvable:$true] %s272_s23 }
  0x3e   : > { %s2459_s7 = sshra.s32 %s271_s26, 4  ;;  %s2466_s29 = scalar_lea.hbm %s3790_s1, 32  ;;  %s2460_s7 = int_to_ptr.hbm [resolvable:$true] %s2459_s7 }
  0x3f   : > { %s2461_s12 = scalar_lea.hbm %s2460_s7, 16  ;;  %p2467_p9 = scmp.lt.s32.totalorder %s2460_s7, %s3790_s1 }
  0x40   : > { %p2462_p10 = scmp.ne.s32.totalorder %s2460_s7, %s2461_s12  ;;  %p2468_p0 = scmp.lt.s32.totalorder %s2466_s29, %s2461_s12 }
  0x42   : > { %p2464_p12 = pnand %p2462_p10, %p2433_p11  ;;  %p2469_p3 = por %p2468_p0, %p2467_p9 }
  0x44   : > { %p2465_p13 = pneg %p2464_p12 }
  0x46   : > { %p2470_p7 = pnand %p2469_p3, %p2465_p13 }
  0x48   : > { %2473 = shalt.err (!%p2470_p7)
}
  0x49   : > { %2343 = dma.hbm_to_vmem [thread:$0]  (!%p2727_p2), %s271_s26, 256, %s273_s23, %s260_s30  }
  0x4a   : > { %281 = sbr.rel (%p2688_p8) target bundleno = 477 (0x1dd), region = 40  ;;  %s2763_s19 = sand.u32 (!%p2688_p8), 1, %s2591_s22  }
  0x4b   : > { %s2766_s20 = sshll.u32 (!%p2688_p8), %s2763_s19, 4  ;;  %s284_s10 = scalar_lea.sflag (!%p2688_p8), [#allocation3], %s2763_s19 }
  0x4c   : > { %s287_s12 = scalar_lea.vmem (!%p2688_p8), [#allocation2], %s2766_s20 }
  0x4f   : > { %2562 = dma.done.wait (%p2675_p4), %s284_s10, 256  }
  0x50   : > { %2564 = vsyncadd (%p2675_p4), %s284_s10, 4294967040  ;;  %s294_s23 = scalar_lea.sflag [#allocation7], %s2763_s19  ;;  %s297_s8 = scalar_lea.vmem [#allocation6], %s2766_s20 }
  0x51   : > { %2566 = dma.done.wait (%p2675_p4), %s294_s23, 256  }
  0x52   : > { %2568 = vsyncadd (%p2675_p4), %s294_s23, 4294967040 }
  0x53   : > { %2570 = dma.done.wait (%p52_p1), [#allocation5], 128  }
  0x54   : > { %2572 = vsyncadd (%p52_p1), [#allocation5], 4294967168 }
  0x55   : > { %2574 = dma.done.wait (%p52_p1), [#allocation10], 16  }
  0x56   : > { %2576 = vsyncadd (%p52_p1), [#allocation10], 4294967280 }
  0x57   : > { %313 = sfence }
  0x58   : > { %s3791_s2 = sld [smem:[#allocation29_spill]]  ;;  %v2603_v1 = vmov 0   ;;  %v353_v3 = vld [vmem:[%s287_s12] sm:$0x7f]  ;;  %v354_v5 = vld [vmem:[%s287_s12 + $0x8] sm:$0x7f] }
  0x59   : > { %2398 = vset.pattern.permute.xlu0 %v2603_v1  ;;  %v355_v6 = vld [vmem:[%s297_s8] sm:$0x7f]  ;;  %v356_v7 = vld [vmem:[%s297_s8 + $0x8] sm:$0x7f]  ;;  %s2797_s27 = scalar_lea.vmem [#allocation11], %s2766_s20  ;;  %s2947_s16 = sld [smem:[#allocation8]] }
  0x5a   : > { %v357_v8 = vadd.f32 %v355_v6, %v353_v3  ;;  %v358_v9 = vadd.f32 %v356_v7, %v354_v5  ;;  %v2604_v38 = vmov 683565275   ;;  %v2605_v40 = vmov 2475754826   ;;  %s2950_s14 = sld [smem:[#allocation8 + $0x1]] }
  0x5b   : > { %v2606_v44 = vmov 2131351028   ;;  %v2607_v47 = vmov 2102212464   ;;  %v2608_v50 = vmov 920167782  }
  0x5c   : > { %v2609_v53 = vmov 1326507024   ;;  %s2952_s26 = sld [smem:[#allocation8 + $0x2]] }
  0x5d   : > { %s2954_s15 = sld [smem:[#allocation8 + $0x3]] }
  0x5e   : > { %v352_v0 = vld [vmem:[%s3791_s2] sm:$0x7f]  ;;  %s2957_s30 = sld [smem:[#allocation8 + $0x4]] }
  0x5f   : > { %361 = vperm.xlu0 %2398, %v352_v0   ;;  %v366_v2 = vsub.f32 0.0, %v352_v0  ;;  %s2960_s7 = sld [smem:[#allocation8 + $0x5]] }
  0x60   : > { %s2962_s4 = sld [smem:[#allocation8 + $0x6]] }
  0x61   : > { %s2966_s17 = sld [smem:[#allocation8 + $0x7]] }
  0x62   : > { %s2968_s29 = sld [smem:[#allocation8 + $0x8]] }
  0x63   : > { %s2974_s9 = sld [smem:[#allocation8 + $0x9]] }
  0x64   : > { %s2980_s3 = sld [smem:[#allocation8 + $0xa]] }
  0x65   : > { %s2988_s10 = sld [smem:[#allocation8 + $0xb]] }
  0x66   : > { %s2993_s12 = sld [smem:[#allocation8 + $0xc]] }
  0x67   : > { %369 = vperm.xlu0 %2398, %v366_v2   ;;  %s2995_s23 = sld [smem:[#allocation8 + $0xd]] }
  0x68   : > { %s3001_s8 = sld [smem:[#allocation8 + $0x80]] }
  0x69   : > { %s3003_s11 = sld [smem:[#allocation8 + $0x81]] }
  0x6a   : > { %s3005_s13 = sld [smem:[#allocation8 + $0x82]] }
  0x6b   : > { %s3007_s0 = sld [smem:[#allocation8 + $0x83]] }
  0x6c   : > { %s3020_s1 = sld [smem:[#allocation8 + $0x84]] }
  0x6d   : > { %s3025_s2 = sld [smem:[#allocation8 + $0x85]] }
  0x6e   : > { %s3029_s22 = sld [smem:[#allocation8 + $0x86]] }
  0x6f   : > { %s3034_s24 = sld [smem:[#allocation8 + $0x87]] }
  0x70   : > { %s3045_s28 = sld [smem:[#allocation8 + $0x88]] }
  0x71   : > { %s3140_s21 = sld [smem:[#allocation9]] }
  0xd1   : > { %v362_v4 = vpop.permute.xlu0 %361 }
  0xd2   : > { %v364_v10 = vmin.f32 %v357_v8, %v362_v4  ;;  %v365_v11 = vmin.f32 %v358_v9, %v362_v4 }
  0xd9   : > { %v370_v12 = vpop.permute.xlu0 %369 }
  0xda   : > { %v2792_v13 = vmax.f32 %v364_v10, %v370_v12  ;;  %v2794_v14 = vmax.f32 %v365_v11, %v370_v12 }
  0xdc   : > { %374 = vst [vmem:[%s2797_s27] sm:$0x7f] %v2792_v13  ;;  %v376_v15 = vand.u32 2147483647, %v2792_v13  ;;  %v379_v16 = vand.u32 2139095040, %v2792_v13  ;;  %v531_v17 = vand.u32 2147483647, %v2794_v14 }
  0xdd   : > { %375 = vst [vmem:[%s2797_s27 + $0x8] sm:$0x7f] %v2794_v14  ;;  %v534_v18 = vand.u32 2139095040, %v2794_v14 }
  0xde   : > { %v380_v19 = vshrl.u32 %v379_v16, 23  ;;  %v383_v20 = vand.u32 8388607, %v376_v15  ;;  %v538_v24 = vand.u32 8388607, %v531_v17 }
  0xdf   : > { %v535_v21 = vshrl.u32 %v534_v18, 23 }
  0xe0   : > { %v2197_v22 = vadd.s32 4294967169, %v380_v19  ;;  %v384_v23 = vor.u32 8388608, %v383_v20  ;;  %v539_v29 = vor.u32 8388608, %v538_v24 }
  0xe1   : > { %v2200_v25 = vadd.s32 4294967169, %v535_v21 }
  0xe2   : > { %v386_v26 = vadd.s32 1, %v2197_v22  ;;  %v2811_v28 = vshll.u32 %v384_v23, 8  ;;  %v2818_v36 = vshll.u32 %v539_v29, 8 }
  0xe3   : > { %v541_v27 = vadd.s32 1, %v2200_v25 }
  0xe4   : > { %vm387_vm0 = vcmp.gt.s32.totalorder %v386_v26, 0  ;;  %v2814_v34 = vand.u32 65535, %v2811_v28  ;;  %v426_v42 = vshrl.u32 %v2811_v28, 16 }
  0xe5   : > { %v388_v30 = vsel %vm387_vm0, %v386_v26, 0  ;;  %vm542_vm1 = vcmp.gt.s32.totalorder %v541_v27, 0 }
  0xe6   : > { %v390_v31 = vand.u32 31, %v388_v30  ;;  %v543_v32 = vsel %vm542_vm1, %v541_v27, 0  ;;  %v2820_v37 = vshrl.u32 %v388_v30, 5 }
  0xe7   : > { %v2816_v35 = vand.u32 31, %v543_v32  ;;  %v2858_v22 = vshrl.u32 %v543_v32, 5 }
  0xe8   : > { %v391_v33 = vsub.s32 32, %v390_v31  ;;  %v393_v39 = vshll.u32 %v2604_v38, %v390_v31  ;;  %v396_v41 = vshll.u32 %v2605_v40, %v390_v31  ;;  %v399_v46 = vshll.u32 %v2606_v44, %v390_v31 }
  0xe9   : > { %v402_v49 = vshll.u32 %v2607_v47, %v390_v31  ;;  %v405_v52 = vshll.u32 %v2608_v50, %v390_v31  ;;  %v2830_v58 = vsub.s32 32, %v2816_v35  ;;  %vm408_vm2 = vcmp.lt.s32.totalorder %v2820_v37, 1 }
  0xea   : > { %v394_v43 = vshrl.u32 %v2605_v40, %v391_v33  ;;  %v397_v45 = vshrl.u32 %v2606_v44, %v391_v33  ;;  %v400_v48 = vshrl.u32 %v2607_v47, %v391_v33  ;;  %v403_v51 = vshrl.u32 %v2608_v50, %v391_v33 }
  0xeb   : > { %v406_v54 = vshrl.u32 %v2609_v53, %v391_v33  ;;  %vm409_vm3 = vcmp.lt.s32.totalorder %v2820_v37, 2  ;;  %v392_v61 = vshrl.u32 %v2604_v38, %v391_v33  ;;  %vm411_vm4 = vcmp.lt.s32.totalorder %v2820_v37, 4 }
  0xec   : > { %v395_v55 = vor.u32 %v394_v43, %v393_v39  ;;  %v398_v56 = vor.u32 %v397_v45, %v396_v41  ;;  %v401_v57 = vor.u32 %v400_v48, %v399_v46  ;;  %v404_v59 = vor.u32 %v403_v51, %v402_v49 }
  0xed   : > { %v407_v60 = vor.u32 %v406_v54, %v405_v52  ;;  %vm410_vm5 = vcmp.lt.s32.totalorder %v2820_v37, 3  ;;  %v548_v3 = vshll.u32 %v2604_v38, %v2816_v35  ;;  %v549_v7 = vshrl.u32 %v2605_v40, %v2830_v58 }
  0xee   : > { %v416_v62 = vsel %vm408_vm2, %v395_v55, %v398_v56  ;;  %v420_v63 = vsel %vm408_vm2, %v398_v56, %v401_v57  ;;  %v417_v0 = vsel %vm411_vm4, %v404_v59, 920167782  ;;  %v413_v4 = vsel %vm411_vm4, %v401_v57, 2102212464 }
  0xef   : > { %v421_v2 = vsel %vm411_vm4, %v407_v60, 1326507024  ;;  %v418_v5 = vsel %vm410_vm5, %v401_v57, %v417_v0  ;;  %v551_v10 = vshll.u32 %v2605_v40, %v2816_v35  ;;  %v552_v11 = vshrl.u32 %v2606_v44, %v2830_v58 }
  0xf0   : > { %v422_v6 = vsel %vm410_vm5, %v404_v59, %v421_v2  ;;  %v419_v8 = vsel %vm409_vm3, %v416_v62, %v418_v5  ;;  %v412_v20 = vsel %vm408_vm2, %v392_v61, %v395_v55  ;;  %v414_v21 = vsel %vm410_vm5, %v398_v56, %v413_v4 }
  0xf1   : > { %v423_v9 = vsel %vm409_vm3, %v420_v63, %v422_v6  ;;  %v449_v18 = vand.u32 65535, %v419_v8  ;;  %v450_v19 = vshrl.u32 %v419_v8, 16  ;;  %v2860_v23 = vor.u32 %v549_v7, %v548_v3 }
  0xf2   : > { %v427_v12 = vand.u32 65535, %v423_v9  ;;  %v428_v16 = vshrl.u32 %v423_v9, 16  ;;  %v2863_v26 = vor.u32 %v552_v11, %v551_v10  ;;  %v555_v27 = vshrl.u32 %v2607_v47, %v2830_v58 }
  0xf3   : > { %v452_v30 = vmul.u32 %v450_v19, %v2814_v34  ;;  %v453_v31 = vmul.u32 %v449_v18, %v426_v42  ;;  %v554_v33 = vshll.u32 %v2606_v44, %v2816_v35  ;;  %v451_v40 = vmul.u32 %v449_v18, %v2814_v34 }
  0xf4   : > { %v430_v24 = vmul.u32 %v428_v16, %v2814_v34  ;;  %v431_v25 = vmul.u32 %v427_v12, %v426_v42  ;;  %v429_v29 = vmul.u32 %v427_v12, %v2814_v34  ;;  %v432_v39 = vmul.u32 %v428_v16, %v426_v42 }
  0xf5   : > { %v454_v41 = vmul.u32 %v450_v19, %v426_v42  ;;  %v455_v48 = vshll.u32 %v452_v30, 16  ;;  %v457_v51 = vshll.u32 %v453_v31, 16  ;;  %v2871_v52 = vor.u32 %v555_v27, %v554_v33 }
  0xf6   : > { %v433_v32 = vshll.u32 %v430_v24, 16  ;;  %v434_v43 = vshrl.u32 %v430_v24, 16  ;;  %v435_v45 = vshll.u32 %v431_v25, 16  ;;  %v436_v46 = vshrl.u32 %v431_v25, 16 }
  0xf7   : > { %vm459_vm7 = vc.u32 %v451_v40, %v455_v48  ;;  %v461_v55 = vadd.s32 %v455_v48, %v451_v40  ;;  %v558_v44 = vshrl.u32 %v2608_v50, %v2830_v58  ;;  %v557_v42 = vshll.u32 %v2607_v47, %v2816_v35 }
  0xf8   : > { %vm437_vm6 = vc.u32 %v429_v29, %v433_v32  ;;  %v439_v49 = vadd.s32 %v433_v32, %v429_v29  ;;  %v460_v34 = vsel %vm459_vm7, 1, %v2603_v1  ;;  %v560_v60 = vshll.u32 %v2608_v50, %v2816_v35 }
  0xf9   : > { %v438_v54 = vsel %vm437_vm6, 1, %v2603_v1  ;;  %v462_v59 = vadd.s32 %v460_v34, %v454_v41  ;;  %vm463_vm9 = vc.u32 %v461_v55, %v457_v51  ;;  %v559_v63 = vor.u32 %v558_v44, %v557_v42 }
  0xfa   : > { %v440_v56 = vadd.s32 %v438_v54, %v432_v39  ;;  %vm441_vm8 = vc.u32 %v439_v49, %v435_v45  ;;  %v464_v62 = vsel %vm463_vm9, 1, %v2603_v1  ;;  %v561_v0 = vshrl.u32 %v2609_v53, %v2830_v58 }
  0xfb   : > { %v442_v57 = vsel %vm441_vm8, 1, %v2603_v1  ;;  %v456_v2 = vshrl.u32 %v452_v30, 16  ;;  %v458_v3 = vshrl.u32 %v453_v31, 16  ;;  %v2885_v4 = vadd.s32 %v461_v55, %v457_v51 }
  0xfc   : > { %v444_v61 = vadd.s32 %v442_v57, %v440_v56  ;;  %v466_v5 = vadd.s32 %v464_v62, %v462_v59  ;;  %v562_v6 = vor.u32 %v561_v0, %v560_v60  ;;  %vm563_vm10 = vcmp.lt.s32.totalorder %v2858_v22, 1 }
  0xfd   : > { %vm566_vm11 = vcmp.lt.s32.totalorder %v2858_v22, 4  ;;  %vm565_vm12 = vcmp.lt.s32.totalorder %v2858_v22, 3  ;;  %v571_v35 = vsel %vm563_vm10, %v2860_v23, %v2863_v26  ;;  %vm564_vm13 = vcmp.lt.s32.totalorder %v2858_v22, 2 }
  0xfe   : > { %v445_v47 = vadd.s32 %v444_v61, %v434_v43  ;;  %v467_v7 = vadd.s32 %v466_v5, %v456_v2  ;;  %v572_v50 = vsel %vm566_vm11, %v559_v63, 920167782  ;;  %v575_v9 = vsel %vm563_vm10, %v2863_v26, %v2871_v52 }
  0xff   : > { %v573_v8 = vsel %vm565_vm12, %v2871_v52, %v572_v50  ;;  %v415_v10 = vsel %vm409_vm3, %v412_v20, %v414_v21  ;;  %v576_v16 = vsel %vm566_vm11, %v562_v6, 1326507024  ;;  %v580_v19 = vand.u32 65535, %v2818_v36 }
 0x100   : > { %v2896_v53 = vadd.s32 %v445_v47, %v436_v46  ;;  %v468_v11 = vadd.s32 %v467_v7, %v458_v3  ;;  %v574_v12 = vsel %vm564_vm13, %v571_v35, %v573_v8  ;;  %v577_v18 = vsel %vm565_vm12, %v559_v63, %v576_v16 }
 0x101   : > { %v604_v24 = vand.u32 65535, %v574_v12  ;;  %v578_v37 = vsel %vm564_vm13, %v575_v9, %v577_v18  ;;  %v581_v20 = vshrl.u32 %v2818_v36, 16  ;;  %v605_v21 = vshrl.u32 %v574_v12, 16 }
 0x102   : > { %vm471_vm14 = vc.u32 %v2896_v53, %v2885_v4  ;;  %v472_v25 = vadd.s32 1, %v468_v11  ;;  %v469_v27 = vmul.u32 %v2811_v28, %v415_v10  ;;  %v582_v29 = vand.u32 65535, %v578_v37 }
 0x103   : > { %v583_v30 = vshrl.u32 %v578_v37, 16  ;;  %v607_v33 = vmul.u32 %v605_v21, %v580_v19  ;;  %v608_v39 = vmul.u32 %v604_v24, %v581_v20  ;;  %v606_v43 = vmul.u32 %v604_v24, %v580_v19 }
 0x104   : > { %v473_v31 = vsel %vm471_vm14, %v472_v25, %v468_v11  ;;  %v586_v41 = vmul.u32 %v582_v29, %v581_v20  ;;  %v609_v45 = vmul.u32 %v605_v21, %v581_v20  ;;  %v584_v49 = vmul.u32 %v582_v29, %v580_v19 }
 0x105   : > { %v474_v32 = vadd.s32 %v473_v31, %v469_v27  ;;  %v585_v40 = vmul.u32 %v583_v30, %v580_v19  ;;  %v610_v46 = vshll.u32 %v607_v33, 16  ;;  %v587_v51 = vmul.u32 %v583_v30, %v581_v20 }
 0x106   : > { %v590_v55 = vshll.u32 %v586_v41, 16  ;;  %v612_v44 = vshll.u32 %v608_v39, 16  ;;  %v568_v61 = vsel %vm566_vm11, %v2871_v52, 2102212464  ;;  %v547_v63 = vshrl.u32 %v2604_v38, %v2830_v58 }
 0x107   : > { %v475_v48 = vadd.s32 536870912, %v474_v32  ;;  %v588_v54 = vshll.u32 %v585_v40, 16  ;;  %vm614_vm15 = vc.u32 %v606_v43, %v610_v46  ;;  %v616_v56 = vadd.s32 %v610_v46, %v606_v43 }
 0x108   : > { %v615_v42 = vsel %vm614_vm15, 1, %v2603_v1  ;;  %v589_v5 = vshrl.u32 %v585_v40, 16  ;;  %v567_v7 = vsel %vm563_vm10, %v547_v63, %v2860_v23  ;;  %v569_v52 = vsel %vm565_vm12, %v2863_v26, %v568_v61 }
 0x109   : > { %v2921_v28 = vshrl.u32 %v475_v48, 30  ;;  %vm592_vm0 = vc.u32 %v584_v49, %v588_v54  ;;  %v594_v34 = vadd.s32 %v588_v54, %v584_v49  ;;  %v617_v59 = vadd.s32 %v615_v42, %v609_v45 }
 0x10a   : > { %v593_v57 = vsel %vm592_vm0, 1, %v2603_v1  ;;  %vm618_vm1 = vc.u32 %v616_v56, %v612_v44  ;;  %v611_v35 = vshrl.u32 %v607_v33, 16  ;;  %v591_v38 = vshrl.u32 %v586_v41, 16 }
 0x10b   : > { %v477_v60 = vshll.u32 %v2921_v28, 30  ;;  %v595_v62 = vadd.s32 %v593_v57, %v587_v51  ;;  %vm596_vm2 = vc.u32 %v594_v34, %v590_v55  ;;  %v619_v2 = vsel %vm618_vm1, 1, %v2603_v1 }
 0x10c   : > { %v597_v0 = vsel %vm596_vm2, 1, %v2603_v1  ;;  %v621_v6 = vadd.s32 %v619_v2, %v617_v59  ;;  %v613_v8 = vshrl.u32 %v608_v39, 16  ;;  %v570_v12 = vsel %vm564_vm13, %v567_v7, %v569_v52 }
 0x10d   : > { %v478_v3 = vsub.s32 %v474_v32, %v477_v60  ;;  %v599_v47 = vadd.s32 %v597_v0, %v595_v62  ;;  %v620_v16 = vadd.s32 %v616_v56, %v612_v44  ;;  %v624_v19 = vmul.u32 %v2818_v36, %v570_v12 }
 0x10e   : > { %v622_v9 = vadd.s32 %v621_v6, %v611_v35  ;;  %v470_v20 = vadd.s32 %v2885_v4, %v2896_v53  ;;  %v500_v36 = vsub.s32 4, %v2921_v28  ;;  %vm378_vm7 = vcmp.lt.s32.totalorder %v2792_v13, 0 }
 0x10f   : > { %vm479_vm3 = vcmp.lt.s32.totalorder %v478_v3, 0  ;;  %v480_v50 = vsub.s32 0, %v478_v3  ;;  %v600_v58 = vadd.s32 %v599_v47, %v589_v5  ;;  %vm377_vm8 = vcmp.le.f32.partialorder %v376_v15, 0.7853982 }
 0x110   : > { %v623_v23 = vadd.s32 %v622_v9, %v613_v8  ;;  %v501_v48 = vsel %vm378_vm7, %v500_v36, %v2921_v28  ;;  %vm533_vm9 = vcmp.lt.s32.totalorder %v2794_v14, 0  ;;  %vm2984_vm11 = vcmp.le.f32.partialorder %v531_v17, 0.7853982 }
 0x111   : > { %v481_v1 = vsel %vm479_vm3, %v480_v50, %v478_v3  ;;  %v2939_v10 = vadd.s32 %v600_v58, %v591_v38  ;;  %v503_v56 = vsel %vm377_vm8, 0, %v501_v48  ;;  %vm519_vm2 = vweird.f32 %v2792_v13 }
 0x112   : > { %v482_v11 = vclz %v481_v1  ;;  %v627_v26 = vadd.s32 1, %v623_v23  ;;  %v520_v57 = vadd.s32 3, %v503_v56  ;;  %v2999_v35 = vand.u32 3, %v503_v56 }
 0x113   : > { %vm626_vm4 = vc.u32 %v2939_v10, %v620_v16  ;;  %v625_v63 = vadd.s32 %v620_v16, %v2939_v10  ;;  %v1165_v48 = vstv %s3001_s8  ;;  %v1205_v59 = vstv %s3020_s1 }
 0x114   : > { %v2198_v18 = vadd.s32 4294967294, %v482_v11  ;;  %v628_v24 = vsel %vm626_vm4, %v627_v26, %v623_v23  ;;  %v2997_v6 = vand.u32 3, %v520_v57  ;;  %vm832_vm14 = vcmp.eq.s32.totalorder %v2999_v35, 0 }
 0x115   : > { %v629_v37 = vadd.s32 %v628_v24, %v624_v19  ;;  %vm835_vm15 = vcmp.eq.s32.totalorder %v2999_v35, 2  ;;  %vm831_vm1 = vcmp.lt.s32.totalorder %v2999_v35, 2  ;;  %v995_v26 = vstv %s2947_s16  ;;  %s3276_s16 = sld [smem:[#allocation8 + $0x89]] }
 0x116   : > { %vm2199_vm5 = vcmp.lt.s32.totalorder %v2198_v18, 0  ;;  %vm523_vm12 = vcmp.eq.s32.totalorder %v2997_v6, 0  ;;  %vm526_vm13 = vcmp.eq.s32.totalorder %v2997_v6, 2  ;;  %vm522_vm0 = vcmp.lt.s32.totalorder %v2997_v6, 2 }
 0x117   : > { %v485_v25 = vsel %vm2199_vm5, 0, %v2198_v18  ;;  %v630_v29 = vadd.s32 536870912, %v629_v37 }
 0x118   : > { %v486_v21 = vsub.s32 32, %v485_v25  ;;  %v490_v27 = vsub.s32 4294967266, %v485_v25  ;;  %v487_v22 = vshll.u32 %v478_v3, %v485_v25  ;;  %v999_v25 = vstv %s2950_s14  ;;  %s3282_s14 = sld [smem:[#allocation8 + $0x8a]] }
 0x119   : > { %v631_v33 = vshrl.u32 %v630_v29, 30  ;;  %v1035_v29 = vstv %s2957_s30  ;;  %s2312_s30 = sshll.u32 %s2666_s25, 4 }
 0x11a   : > { %v488_v30 = vshrl.u32 %v470_v20, %v486_v21  ;;  %v491_v31 = vadd.s32 127, %v490_v27  ;;  %v1023_v27 = vstv %s2954_s15  ;;  %s3303_s15 = sld [smem:[#allocation8 + $0x8c]] }
 0x11b   : > { %v632_v40 = vshll.u32 %v631_v33, 30  ;;  %v655_v55 = vsub.s32 4, %v631_v33 }
 0x11c   : > { %v489_v39 = vor.u32 %v488_v30, %v487_v22  ;;  %v492_v32 = vshll.u32 %v491_v31, 23  ;;  %v1047_v30 = vstv %s2960_s7  ;;  %v1059_v31 = vstv %s2962_s4  ;;  %s2013_s7 = sshll.u32 %s2797_s27, 4  ;;  %s2011_s4 = scalar_lea.hbm %s3761_s5, %s2312_s30  ;;  %s3319_s7 = int_to_ptr.vmem [resolvable:$true] %s2013_s7 }
 0x11d   : > { %v633_v43 = vsub.s32 %v629_v37, %v632_v40  ;;  %v656_v15 = vsel %vm533_vm9, %v655_v55, %v631_v33  ;;  %v1011_v37 = vstv %s2952_s26  ;;  %v1071_v33 = vstv %s2966_s17  ;;  %s3289_s26 = sld [smem:[#allocation8 + $0x8b]]  ;;  %s2015_s27 = sshll.u32 %s2011_s4, 4  ;;  %s2016_s27 = int_to_ptr.hbm [resolvable:$true] %s2015_s27 }
 0x11e   : > { %v493_v41 = vor.u32 4788187, %v492_v32  ;;  %v496_v4 = vcvt.s32.f32 %v489_v39  ;;  %v658_v3 = vsel %vm2984_vm11, 0, %v656_v15  ;;  %v1077_v40 = vstv %s2968_s29  ;;  %s2503_s17 = sshra.s32 %s2016_s27, 4  ;;  %s2504_s17 = int_to_ptr.hbm [resolvable:$true] %s2503_s17 }
 0x11f   : > { %vm634_vm6 = vcmp.lt.s32.totalorder %v633_v43, 0  ;;  %v635_v53 = vsub.s32 0, %v633_v43  ;;  %v675_v58 = vadd.s32 3, %v658_v3  ;;  %v3013_v12 = vand.u32 3, %v658_v3  ;;  %p2510_p2 = scmp.lt.s32.totalorder %s2504_s17, %s3761_s5 }
 0x120   : > { %v494_v45 = vand.u32 2147483647, %v493_v41  ;;  %v1089_v41 = vstv %s2974_s9  ;;  %s2509_s9 = scalar_lea.hbm %s3761_s5, 32 }
 0x121   : > { %v636_v49 = vsel %vm634_vm6, %v635_v53, %v633_v43  ;;  %v3016_v18 = vand.u32 3, %v675_v58  ;;  %vm989_vm4 = vcmp.eq.s32.totalorder %v3013_v12, 2  ;;  %vm986_vm6 = vcmp.eq.s32.totalorder %v3013_v12, 0 }
 0x122   : > { %v497_v46 = vmul.f32 %v496_v4, %v494_v45  ;;  %v637_v54 = vclz %v636_v49  ;;  %v1113_v45 = vstv %s2988_s10  ;;  %v1125_v4 = vstv %s2993_s12 }
 0x123   : > { %v1169_v49 = vstv %s3003_s11  ;;  %vm681_vm3 = vcmp.eq.s32.totalorder %v3016_v18, 2  ;;  %vm678_vm5 = vcmp.eq.s32.totalorder %v3016_v18, 0 }
 0x124   : > { %v498_v51 = vxor.u32 2147483648, %v497_v46  ;;  %v2201_v34 = vadd.s32 4294967294, %v637_v54 }
 0x126   : > { %v499_v44 = vsel %vm378_vm7, %v498_v51, %v497_v46  ;;  %vm2202_vm10 = vcmp.lt.s32.totalorder %v2201_v34, 0  ;;  %v1137_v46 = vstv %s2995_s23  ;;  %vm677_vm7 = vcmp.lt.s32.totalorder %v3016_v18, 2 }
 0x127   : > { %v2971_v28 = vsel %vm377_vm8, %v2792_v13, %v499_v44  ;;  %v640_v60 = vsel %vm2202_vm10, 0, %v2201_v34  ;;  %v1181_v44 = vstv %s3005_s13  ;;  %vm985_vm8 = vcmp.lt.s32.totalorder %v3013_v12, 2 }
 0x128   : > { %v504_v42 = vmul.f32 %v2971_v28, %v2971_v28  ;;  %v641_v0 = vsub.s32 32, %v640_v60  ;;  %v645_v2 = vsub.s32 4294967266, %v640_v60  ;;  %v642_v7 = vshll.u32 %v633_v43, %v640_v60 }
 0x129   : > { %v1101_v43 = vstv %s2980_s3 }
 0x12a   : > { %v505_v61 = vmul.f32 -0.001358992, %v504_v42  ;;  %v512_v62 = vmul.f32 -0.00019511016, %v504_v42  ;;  %v643_v17 = vshrl.u32 %v625_v63, %v641_v0  ;;  %v646_v52 = vadd.s32 127, %v645_v2 }
 0x12b   : > { %v1217_v63 = vstv %s3025_s2  ;;  %v1229_v0 = vstv %s3029_s22  ;;  %s3338_s2 = sld [smem:[#allocation8 + $0x8d]]  ;;  %s1995_s22 = scalar_lea.sflag [#allocation4], %s2763_s19 }
 0x12c   : > { %v506_v5 = vadd.f32 0.041655596, %v505_v61  ;;  %v513_v47 = vadd.f32 0.008332121, %v512_v62  ;;  %v644_v8 = vor.u32 %v643_v17, %v642_v7  ;;  %v647_v9 = vshll.u32 %v646_v52, 23 }
 0x12e   : > { %v507_v50 = vmul.f32 %v506_v5, %v504_v42  ;;  %v514_v38 = vmul.f32 %v513_v47, %v504_v42  ;;  %v648_v11 = vor.u32 4788187, %v647_v9  ;;  %v651_v24 = vcvt.s32.f32 %v644_v8 }
 0x12f   : > { %v1241_v47 = vstv %s3034_s24  ;;  %s2505_s24 = scalar_lea.hbm %s2504_s17, 16 }
 0x130   : > { %v508_v1 = vadd.f32 -0.4999988, %v507_v50  ;;  %v515_v10 = vadd.f32 -0.16666654, %v514_v38  ;;  %v649_v19 = vand.u32 2147483647, %v648_v11  ;;  %p2506_p1 = scmp.ne.s32.totalorder %s2504_s17, %s2505_s24  ;;  %p2511_p11 = scmp.lt.s32.totalorder %s2509_s9, %s2505_s24 }
 0x132   : > { %v509_v16 = vmul.f32 %v508_v1, %v504_v42  ;;  %v516_v23 = vmul.f32 %v515_v10, %v504_v42  ;;  %v652_v22 = vmul.f32 %v651_v24, %v649_v19  ;;  %v1193_v42 = vstv %s3007_s0  ;;  %p2507_p4 = pnand %p2506_p1, %p2714_p5  ;;  %p2512_p10 = por %p2511_p11, %p2510_p2 }
 0x133   : > { %v1247_v1 = vstv %s3045_s28 }
 0x134   : > { %v510_v20 = vadd.f32 1.0, %v509_v16  ;;  %v517_v21 = vadd.f32 1.0, %v516_v23  ;;  %v653_v36 = vxor.u32 2147483648, %v652_v22  ;;  %p2508_p8 = pneg %p2507_p4 }
 0x136   : > { %v518_v39 = vmul.f32 %v517_v21, %v2971_v28  ;;  %v527_v32 = vxor.u32 2147483648, %v510_v20  ;;  %v654_v54 = vsel %vm533_vm9, %v653_v36, %v652_v22  ;;  %vm674_vm9 = vweird.f32 %v2794_v14  ;;  %p2513_p12 = pnand %p2512_p10, %p2508_p8 }
 0x137   : > { %v3059_v34 = vsel %vm2984_vm11, %v2794_v14, %v654_v54 }
 0x138   : > { %v524_v53 = vxor.u32 2147483648, %v518_v39  ;;  %v528_v51 = vsel %vm526_vm13, %v527_v32, %v518_v39  ;;  %v837_v55 = vsel %vm835_vm15, %v527_v32, %v518_v39  ;;  %v659_v57 = vmul.f32 %v3059_v34, %v3059_v34 }
 0x13a   : > { %v525_v56 = vsel %vm523_vm12, %v510_v20, %v524_v53  ;;  %v834_v28 = vsel %vm832_vm14, %v510_v20, %v524_v53  ;;  %v660_v2 = vmul.f32 -0.001358992, %v659_v57  ;;  %v667_v3 = vmul.f32 -0.00019511016, %v659_v57 }
 0x13b   : > { %v529_v15 = vsel %vm522_vm0, %v525_v56, %v528_v51  ;;  %v838_v60 = vsel %vm831_vm1, %v834_v28, %v837_v55 }
 0x13c   : > { %v3073_v61 = vsel %vm519_vm2, nan, %v529_v15  ;;  %v3077_v62 = vsel %vm519_vm2, nan, %v838_v60  ;;  %v661_v52 = vadd.f32 0.041655596, %v660_v2  ;;  %v668_v35 = vadd.f32 0.008332121, %v667_v3 }
 0x13d   : > { %v1000_v5 = vmul.f32 %v999_v25, %v3073_v61  ;;  %v1012_v17 = vmul.f32 %v1011_v37, %v3073_v61  ;;  %v1024_v6 = vmul.f32 %v1023_v27, %v3073_v61  ;;  %v1036_v13 = vmul.f32 %v1035_v29, %v3073_v61 }
 0x13e   : > { %v1048_v7 = vmul.f32 %v1047_v30, %v3073_v61  ;;  %v996_v50 = vmul.f32 %v995_v26, %v3073_v61  ;;  %v1060_v9 = vmul.f32 %v1059_v31, %v3073_v61  ;;  %v662_v10 = vmul.f32 %v661_v52, %v659_v57 }
 0x13f   : > { %v1004_v38 = vrot.slane %v1000_v5, 1  ;;  %v1016_v58 = vrot.slane %v1012_v17, 2  ;;  %v1028_v8 = vrot.slane %v1024_v6, 3  ;;  %v669_v11 = vmul.f32 %v668_v35, %v659_v57 }
 0x140   : > { %v1040_v23 = vrot.slane %v1036_v13, 4  ;;  %v1052_v19 = vrot.slane %v1048_v7, 5  ;;  %v3107_v24 = vmul.f32 %v1077_v40, %v3077_v62  ;;  %v3112_v20 = vmul.f32 %v1089_v41, %v3077_v62 }
 0x141   : > { %v1008_v16 = vadd.f32 %v1004_v38, %v996_v50  ;;  %v3117_v21 = vmul.f32 %v1101_v43, %v3077_v62  ;;  %v663_v22 = vadd.f32 -0.4999988, %v662_v10  ;;  %v670_v39 = vadd.f32 -0.16666654, %v669_v11 }
 0x142   : > { %v3124_v36 = vmul.f32 %v1113_v45, %v3077_v62  ;;  %v1064_v53 = vrot.slane %v1060_v9, 6  ;;  %v1072_v51 = vmul.f32 %v1071_v33, %v3077_v62  ;;  %v1082_v54 = vrot.slane %v3107_v24, 1 }
 0x143   : > { %v1020_v32 = vadd.f32 %v1016_v58, %v1008_v16  ;;  %v1094_v55 = vrot.slane %v3112_v20, 2  ;;  %v664_v56 = vmul.f32 %v663_v22, %v659_v57  ;;  %v671_v28 = vmul.f32 %v670_v39, %v659_v57 }
 0x144   : > { %v3138_v60 = vmul.f32 %v1125_v4, %v3077_v62  ;;  %v1106_v2 = vrot.slane %v3117_v21, 3  ;;  %v1118_v3 = vrot.slane %v3124_v36, 4  ;;  %v3148_v57 = vmul.f32 %v1137_v46, %v3077_v62 }
 0x145   : > { %v1032_v15 = vadd.f32 %v1028_v8, %v1020_v32  ;;  %v1170_v5 = vmul.f32 %v1169_v49, %v3073_v61  ;;  %v665_v17 = vadd.f32 1.0, %v664_v56  ;;  %v672_v6 = vadd.f32 1.0, %v671_v28 }
 0x146   : > { %v1182_v7 = vmul.f32 %v1181_v44, %v3073_v61  ;;  %v1166_v52 = vmul.f32 %v1165_v48, %v3073_v61  ;;  %v1194_v50 = vmul.f32 %v1193_v42, %v3073_v61  ;;  %v3165_v38 = vmul.f32 %v1205_v59, %v3073_v61 }
 0x147   : > { %v1044_v13 = vadd.f32 %v1040_v23, %v1032_v15  ;;  %v1174_v35 = vrot.slane %v1170_v5, 1  ;;  %v673_v58 = vmul.f32 %v672_v6, %v3059_v34  ;;  %v682_v8 = vxor.u32 2147483648, %v665_v17 }
 0x148   : > { %v1130_v10 = vrot.slane %v3138_v60, 5  ;;  %v1142_v11 = vrot.slane %v3148_v57, 6  ;;  %v1186_v23 = vrot.slane %v1182_v7, 2  ;;  %v3173_v24 = vmul.f32 %v1217_v63, %v3073_v61 }
 0x149   : > { %v1056_v9 = vadd.f32 %v1052_v19, %v1044_v13  ;;  %v1178_v16 = vadd.f32 %v1174_v35, %v1166_v52  ;;  %v679_v22 = vxor.u32 2147483648, %v673_v58  ;;  %v1198_v32 = vrot.slane %v1194_v50, 3 }
 0x14a   : > { %v1210_v56 = vrot.slane %v3165_v38, 4  ;;  %v683_v34 = vsel %vm681_vm3, %v682_v8, %v673_v58  ;;  %v991_v19 = vsel %vm989_vm4, %v682_v8, %v673_v58  ;;  %v3183_v15 = vmul.f32 %v1229_v0, %v3073_v61 }
 0x14b   : > { %v1068_v39 = vadd.f32 %v1064_v53, %v1056_v9  ;;  %v1190_v28 = vadd.f32 %v1186_v23, %v1178_v16  ;;  %v680_v53 = vsel %vm678_vm5, %v665_v17, %v679_v22  ;;  %v988_v5 = vsel %vm986_vm6, %v665_v17, %v679_v22 }
 0x14c   : > { %v1149_v13 = vstv %s3140_s21  ;;  %v684_v7 = vsel %vm677_vm7, %v680_v53, %v683_v34  ;;  %v992_v52 = vsel %vm985_vm8, %v988_v5, %v991_v19  ;;  %v1222_v35 = vrot.slane %v3173_v24, 5 }
 0x14d   : > { %v1074_v6 = vadd.f32 %v1072_v51, %v1068_v39  ;;  %v3198_v50 = vmul.f32 %v1241_v47, %v3077_v62  ;;  %v3202_v51 = vsel %vm674_vm9, nan, %v684_v7  ;;  %v3206_v18 = vsel %vm674_vm9, nan, %v992_v52 }
 0x14e   : > { %v1202_v17 = vadd.f32 %v1198_v32, %v1190_v28  ;;  %v1234_v12 = vrot.slane %v3183_v15, 6  ;;  %v1001_v58 = vmul.f32 %v999_v25, %v3202_v51  ;;  %v1013_v8 = vmul.f32 %v1011_v37, %v3202_v51 }
 0x14f   : > { %v1025_v9 = vmul.f32 %v1023_v27, %v3202_v51  ;;  %v1086_v16 = vadd.f32 %v1082_v54, %v1074_v6  ;;  %v1037_v14 = vmul.f32 %v1035_v29, %v3202_v51  ;;  %v1049_v23 = vmul.f32 %v1047_v30, %v3202_v51 }
 0x150   : > { %v1061_v22 = vmul.f32 %v1059_v31, %v3202_v51  ;;  %v3230_v25 = vmul.f32 %v1247_v1, %v3077_v62  ;;  %v997_v37 = vmul.f32 %v995_v26, %v3202_v51  ;;  %v1005_v27 = vrot.slane %v1001_v58, 1 }
 0x151   : > { %v3238_v29 = vmul.f32 %v1071_v33, %v3206_v18  ;;  %v3243_v30 = vmul.f32 %v1077_v40, %v3206_v18  ;;  %v1017_v54 = vrot.slane %v1013_v8, 2  ;;  %v1029_v31 = vrot.slane %v1025_v9, 3 }
 0x152   : > { %v1041_v39 = vrot.slane %v1037_v14, 4  ;;  %v3248_v32 = vmul.f32 %v1089_v41, %v3206_v18  ;;  %v1009_v34 = vadd.f32 %v1005_v27, %v997_v37  ;;  %v1053_v19 = vrot.slane %v1049_v23, 5 }
 0x153   : > { %v1098_v26 = vadd.f32 %v1094_v55, %v1086_v16  ;;  %v3255_v33 = vmul.f32 %v1101_v43, %v3206_v18  ;;  %v1065_v28 = vrot.slane %v1061_v22, 6  ;;  %v3260_v40 = vmul.f32 %v1113_v45, %v3206_v18 }
 0x154   : > { %v3265_v53 = vmul.f32 %v1125_v4, %v3206_v18  ;;  %v3270_v41 = vmul.f32 %v1137_v46, %v3206_v18  ;;  %v1021_v20 = vadd.f32 %v1017_v54, %v1009_v34  ;;  %v1083_v43 = vrot.slane %v3243_v30, 1 }
 0x155   : > { %v1095_v55 = vrot.slane %v3248_v32, 2  ;;  %v1110_v45 = vadd.f32 %v1106_v2, %v1098_v26  ;;  %v1107_v4 = vrot.slane %v3255_v33, 3  ;;  %v1119_v5 = vrot.slane %v3260_v40, 4 }
 0x156   : > { %v1131_v46 = vrot.slane %v3265_v53, 5  ;;  %v1143_v6 = vrot.slane %v3270_v41, 6  ;;  %v1033_v7 = vadd.f32 %v1029_v31, %v1021_v20  ;;  %v1158_v52 = vlaneseq }
 0x157   : > { %v1122_v21 = vadd.f32 %v1118_v3, %v1110_v45  ;;  %v1171_v2 = vmul.f32 %v1169_v49, %v3202_v51  ;;  %v1167_v58 = vmul.f32 %v1165_v48, %v3202_v51  ;;  %v1183_v8 = vmul.f32 %v1181_v44, %v3202_v51 }
 0x158   : > { %v1195_v9 = vmul.f32 %v1193_v42, %v3202_v51  ;;  %v1207_v36 = vmul.f32 %v1205_v59, %v3202_v51  ;;  %v1045_v3 = vadd.f32 %v1041_v39, %v1033_v7  ;;  %v1214_v48 = vadd.f32 %v1210_v56, %v1202_v17 }
 0x159   : > { %v1134_v49 = vadd.f32 %v1130_v10, %v1122_v21  ;;  %v1175_v16 = vrot.slane %v1171_v2, 1  ;;  %v1187_v44 = vrot.slane %v1183_v8, 2  ;;  %v1219_v59 = vmul.f32 %v1217_v63, %v3202_v51 }
 0x15a   : > { %v1199_v42 = vrot.slane %v1195_v9, 3  ;;  %v1211_v14 = vrot.slane %v1207_v36, 4  ;;  %v1057_v60 = vadd.f32 %v1053_v19, %v1045_v3  ;;  %v1226_v56 = vadd.f32 %v1222_v35, %v1214_v48 }
 0x15b   : > { %v1146_v38 = vadd.f32 %v1142_v11, %v1134_v49  ;;  %v1179_v10 = vadd.f32 %v1175_v16, %v1167_v58  ;;  %v1223_v17 = vrot.slane %v1219_v59, 5  ;;  %v1231_v63 = vmul.f32 %v1229_v0, %v3202_v51 }
 0x15c   : > { %v3331_v23 = vmul.f32 %v1241_v47, %v3206_v18  ;;  %v3336_v22 = vmul.f32 %v1247_v1, %v3206_v18  ;;  %v1069_v57 = vadd.f32 %v1065_v28, %v1057_v60  ;;  %v1238_v35 = vadd.f32 %v1234_v12, %v1226_v56 }
 0x15d   : > { %v3342_v11 = vadd.f32 %v1149_v13, %v1146_v38  ;;  %v1191_v24 = vadd.f32 %v1187_v44, %v1179_v10 }
 0x15e   : > { %2516 = shalt.err (!%p2513_p12)
}
 0x15f   : > { %2326 = dma.vmem_to_hbm [thread:$0]  (%p2714_p5), %s3319_s7, 256, %s2016_s27, %s1995_s22   ;;  %v1235_v0 = vrot.slane %v1231_v63, 6  ;;  %v1252_v47 = vrot.slane %v3230_v25, 1  ;;  %v1253_v1 = vrot.slane %v3336_v22, 1  ;;  %v1259_v15 = vstv %s3276_s16 }
 0x160   : > { %s3361_s12 = sld [smem:[#allocation9 + $0x1]]  ;;  %v1075_v12 = vadd.f32 %v3238_v29, %v1069_v57  ;;  %v1203_v37 = vadd.f32 %v1199_v42, %v1191_v24  ;;  %v1244_v27 = vadd.f32 %v3198_v50, %v1238_v35  ;;  %v1260_v54 = vmul.f32 %v1259_v15, %v3077_v62  ;;  %s3441_s1 = scalar_lea.vmem [#allocation12], %s2766_s20 }
 0x161   : > { %s3366_s23 = sld [smem:[#allocation8 + $0x100]]  ;;  %v1261_v31 = vmul.f32 %v1259_v15, %v3206_v18  ;;  %v1271_v39 = vstv %s3282_s14  ;;  %v1283_v34 = vstv %s3289_s26  ;;  %v1295_v19 = vstv %s3303_s15  ;;  %s2000_s25 = scalar_lea.sflag [#allocation13], %s2763_s19 }
 0x162   : > { %s3372_s8 = sld [smem:[#allocation8 + $0x101]]  ;;  %v1087_v25 = vadd.f32 %v1083_v43, %v1075_v12  ;;  %v1215_v26 = vadd.f32 %v1211_v14, %v1203_v37  ;;  %v1256_v28 = vadd.f32 %v1252_v47, %v1244_v27  ;;  %v1264_v29 = vrot.slane %v1260_v54, 2 }
 0x163   : > { %v1265_v20 = vrot.slane %v1261_v31, 2  ;;  %v1272_v50 = vmul.f32 %v1271_v39, %v3077_v62  ;;  %v1273_v45 = vmul.f32 %v1271_v39, %v3206_v18  ;;  %v1284_v7 = vmul.f32 %v1283_v34, %v3077_v62  ;;  %s3382_s11 = sld [smem:[#allocation8 + $0x102]] }
 0x164   : > { %v1099_v21 = vadd.f32 %v1095_v55, %v1087_v25  ;;  %v1227_v2 = vadd.f32 %v1223_v17, %v1215_v26  ;;  %v1268_v58 = vadd.f32 %v1264_v29, %v1256_v28  ;;  %v1285_v30 = vmul.f32 %v1283_v34, %v3206_v18  ;;  %s3388_s13 = sld [smem:[#allocation8 + $0x103]] }
 0x165   : > { %v1276_v43 = vrot.slane %v1272_v50, 3  ;;  %v1277_v8 = vrot.slane %v1273_v45, 3  ;;  %v1288_v9 = vrot.slane %v1284_v7, 4  ;;  %v1296_v36 = vmul.f32 %v1295_v19, %v3077_v62  ;;  %s3401_s16 = sld [smem:[#allocation8 + $0x104]] }
 0x166   : > { %v1111_v3 = vadd.f32 %v1107_v4, %v1099_v21  ;;  %v1239_v49 = vadd.f32 %v1235_v0, %v1227_v2  ;;  %v1289_v16 = vrot.slane %v1285_v30, 4  ;;  %v1297_v32 = vmul.f32 %v1295_v19, %v3206_v18  ;;  %s3406_s14 = sld [smem:[#allocation8 + $0x105]] }
 0x167   : > { %vm1155_vm10 = vcmask 1040384   ;;  %v1280_v55 = vadd.f32 %v1276_v43, %v1268_v58  ;;  %v1300_v48 = vrot.slane %v1296_v36, 5  ;;  %v1307_v44 = vstv %s3338_s2  ;;  %s3417_s26 = sld [smem:[#allocation8 + $0x106]] }
 0x168   : > { %v1319_v42 = vstv %s3361_s12  ;;  %v1123_v14 = vadd.f32 %v1119_v5, %v1111_v3  ;;  %vm3395_vm11 = vcmp.lt.s32.totalorder %v1158_v52, 256  ;;  %v1245_v4 = vadd.f32 %v3331_v23, %v1239_v49  ;;  %s3424_s15 = sld [smem:[#allocation8 + $0x107]] }
 0x169   : > { %v1301_v59 = vrot.slane %v1297_v32, 5  ;;  %v1308_v60 = vmul.f32 %v1307_v44, %v3077_v62  ;;  %v1292_v38 = vadd.f32 %v1288_v9, %v1280_v55  ;;  %v1309_v10 = vmul.f32 %v1307_v44, %v3206_v18  ;;  %s3428_s7 = sld [smem:[#allocation8 + $0x108]] }
 0x16a   : > { %v1331_v56 = vstv %s3366_s23  ;;  %v1335_v17 = vstv %s3372_s8  ;;  %v1135_v40 = vadd.f32 %v1131_v46, %v1123_v14  ;;  %v1257_v5 = vadd.f32 %v1253_v1, %v1245_v4  ;;  %s3434_s21 = sld [smem:[#allocation8 + $0x109]] }
 0x16b   : > { %v1312_v52 = vrot.slane %v1308_v60, 6  ;;  %v1332_v63 = vmul.f32 %v1331_v56, %v3073_v61  ;;  %v1304_v23 = vadd.f32 %v1300_v48, %v1292_v38  ;;  %v1313_v22 = vrot.slane %v1309_v10, 6  ;;  %s3438_s0 = sld [smem:[#allocation8 + $0x10a]] }
 0x16c   : > { %v1333_v57 = vmul.f32 %v1331_v56, %v3202_v51  ;;  %v1336_v24 = vmul.f32 %v1335_v17, %v3073_v61  ;;  %v1147_v35 = vadd.f32 %v1143_v6, %v1135_v40  ;;  %v1269_v0 = vadd.f32 %v1265_v20, %v1257_v5  ;;  %s3451_s20 = sld [smem:[#allocation8 + $0x10b]] }
 0x16d   : > { %v1337_v53 = vmul.f32 %v1335_v17, %v3202_v51  ;;  %v1347_v46 = vstv %s3382_s11  ;;  %v1316_v47 = vadd.f32 %v1312_v52, %v1304_v23  ;;  %v1359_v41 = vstv %s3388_s13  ;;  %s3457_s4 = sld [smem:[#allocation8 + $0x10c]] }
 0x16e   : > { %v1340_v1 = vrot.slane %v1336_v24, 1  ;;  %v1348_v15 = vmul.f32 %v1347_v46, %v3073_v61  ;;  %v1349_v12 = vmul.f32 %v1347_v46, %v3202_v51  ;;  %v1151_v37 = vadd.f32 %v1149_v13, %v1147_v35  ;;  %s3461_s27 = sld [smem:[#allocation8 + $0x10d]] }
 0x16f   : > { %v1281_v27 = vadd.f32 %v1277_v8, %v1269_v0  ;;  %v1341_v54 = vrot.slane %v1337_v53, 1  ;;  %v1320_v6 = vadd.f32 %v1319_v42, %v1316_v47  ;;  %v1360_v13 = vmul.f32 %v1359_v41, %v3073_v61  ;;  %s3464_s2 = sld [smem:[#allocation8 + $0x180]] }
 0x170   : > { %v1344_v31 = vadd.f32 %v1340_v1, %v1332_v63  ;;  %v1352_v39 = vrot.slane %v1348_v15, 2  ;;  %v1353_v34 = vrot.slane %v1349_v12, 2  ;;  %v1154_v19 = vrot.slane %v1151_v37, 7  ;;  %s3468_s22 = sld [smem:[#allocation8 + $0x181]] }
 0x171   : > { %v1293_v25 = vadd.f32 %v1289_v16, %v1281_v27  ;;  %v1345_v26 = vadd.f32 %v1341_v54, %v1333_v57  ;;  %v1361_v29 = vmul.f32 %v1359_v41, %v3202_v51  ;;  %v1371_v20 = vstv %s3401_s16  ;;  %s3474_s17 = sld [smem:[#allocation9 + $0x2]] }
 0x172   : > { %v1356_v28 = vadd.f32 %v1352_v39, %v1344_v31  ;;  %v1383_v50 = vstv %s3406_s14  ;;  %v1156_v45 = vsel %vm1155_vm10, %v3342_v11, %v1154_v19  ;;  %v1364_v2 = vrot.slane %v1360_v13, 3  ;;  %s3480_s24 = sld [smem:[#allocation8 + $0x182]] }
 0x173   : > { %v1305_v7 = vadd.f32 %v1301_v59, %v1293_v25  ;;  %v1357_v21 = vadd.f32 %v1353_v34, %v1345_v26  ;;  %1162 = vst.msk [vmem:[%s3441_s1] ss:$8 sm:$0x3] %vm3395_vm11, %v1156_v45  ;;  %v1365_v58 = vrot.slane %v1361_v29, 3  ;;  %v1372_v30 = vmul.f32 %v1371_v20, %v3073_v61  ;;  %s3485_s28 = sld [smem:[#allocation8 + $0x183]] }
 0x174   : > { %v1373_v43 = vmul.f32 %v1371_v20, %v3202_v51  ;;  %v1384_v8 = vmul.f32 %v1383_v50, %v3073_v61  ;;  %v1368_v9 = vadd.f32 %v1364_v2, %v1356_v28  ;;  %v1385_v36 = vmul.f32 %v1383_v50, %v3202_v51  ;;  %s3488_s29 = sld [smem:[#allocation8 + $0x184]] }
 0x175   : > { %v1317_v11 = vadd.f32 %v1313_v22, %v1305_v7  ;;  %v1395_v3 = vstv %s3417_s26  ;;  %v1369_v49 = vadd.f32 %v1365_v58, %v1357_v21  ;;  %v1376_v16 = vrot.slane %v1372_v30, 4  ;;  %s3491_s9 = sld [smem:[#allocation8 + $0x185]] }
 0x176   : > { %v1377_v32 = vrot.slane %v1373_v43, 4  ;;  %v1388_v55 = vrot.slane %v1384_v8, 5  ;;  %v1389_v44 = vrot.slane %v1385_v36, 5  ;;  %v1396_v14 = vmul.f32 %v1395_v3, %v3073_v61  ;;  %s3507_s3 = sld [smem:[#allocation8 + $0x186]] }
 0x177   : > { %v1321_v48 = vadd.f32 %v1319_v42, %v1317_v11  ;;  %v1397_v4 = vmul.f32 %v1395_v3, %v3202_v51  ;;  %v1380_v59 = vadd.f32 %v1376_v16, %v1368_v9  ;;  %v1407_v38 = vstv %s3424_s15  ;;  %s3513_s10 = sld [smem:[#allocation8 + $0x187]] }
 0x178   : > { %v1381_v60 = vadd.f32 %v1377_v32, %v1369_v49  ;;  %v1413_v10 = vstv %s3428_s7  ;;  %v1400_v17 = vrot.slane %v1396_v14, 6  ;;  %v1408_v42 = vmul.f32 %v1407_v38, %v3077_v62  ;;  %s3519_s12 = sld [smem:[#allocation8 + $0x188]] }
 0x179   : > { %v1324_v56 = vrot.slane %v1321_v48, 7  ;;  %v1401_v40 = vrot.slane %v1397_v4, 6  ;;  %v1392_v5 = vadd.f32 %v1388_v55, %v1380_v59  ;;  %v1409_v63 = vmul.f32 %v1407_v38, %v3206_v18  ;;  %s3521_s23 = sld [smem:[#allocation8 + $0x189]] }
 0x17a   : > { %v1393_v52 = vadd.f32 %v1389_v44, %v1381_v60  ;;  %v1414_v23 = vmul.f32 %v1413_v10, %v3077_v62  ;;  %v1415_v57 = vmul.f32 %v1413_v10, %v3206_v18  ;;  %v1425_v24 = vstv %s3434_s21  ;;  %s3523_s8 = sld [smem:[#allocation8 + $0x18a]] }
 0x17b   : > { %v1325_v22 = vsel %vm1155_vm10, %v1320_v6, %v1324_v56  ;;  %v1437_v35 = vstv %s3438_s0  ;;  %v1404_v0 = vadd.f32 %v1400_v17, %v1392_v5  ;;  %v1426_v47 = vmul.f32 %v1425_v24, %v3077_v62  ;;  %s3527_s11 = sld [smem:[#allocation8 + $0x18b]] }
 0x17c   : > { %2237 = vst.msk [vmem:[%s3441_s1 + $0x1] ss:$8 sm:$0x3] %vm3395_vm11, %v1325_v22  ;;  %v1405_v53 = vadd.f32 %v1401_v40, %v1393_v52  ;;  %v1418_v46 = vrot.slane %v1414_v23, 1  ;;  %v1419_v1 = vrot.slane %v1415_v57, 1  ;;  %v1427_v15 = vmul.f32 %v1425_v24, %v3206_v18  ;;  %s3532_s13 = sld [smem:[#allocation8 + $0x18c]] }
 0x17d   : > { %v1438_v12 = vmul.f32 %v1437_v35, %v3077_v62  ;;  %v1439_v37 = vmul.f32 %v1437_v35, %v3206_v18  ;;  %v1410_v27 = vadd.f32 %v1408_v42, %v1404_v0  ;;  %v1430_v41 = vrot.slane %v1426_v47, 2  ;;  %s3538_s16 = sld [smem:[#allocation8 + $0x18d]] }
 0x17e   : > { %v1411_v54 = vadd.f32 %v1409_v63, %v1405_v53  ;;  %v1449_v6 = vstv %s3451_s20  ;;  %v1431_v31 = vrot.slane %v1427_v15, 2  ;;  %v1461_v28 = vstv %s3457_s4  ;;  %s3545_s14 = sld [smem:[#allocation8 + $0x200]] }
 0x17f   : > { %v1442_v39 = vrot.slane %v1438_v12, 3  ;;  %v1443_v34 = vrot.slane %v1439_v37, 3  ;;  %v1450_v19 = vmul.f32 %v1449_v6, %v3077_v62  ;;  %v1422_v25 = vadd.f32 %v1418_v46, %v1410_v27  ;;  %s3549_s26 = sld [smem:[#allocation8 + $0x201]] }
 0x180   : > { %v1423_v26 = vadd.f32 %v1419_v1, %v1411_v54  ;;  %v1451_v13 = vmul.f32 %v1449_v6, %v3206_v18  ;;  %v1462_v20 = vmul.f32 %v1461_v28, %v3077_v62  ;;  %v1463_v50 = vmul.f32 %v1461_v28, %v3206_v18  ;;  %s3553_s15 = sld [smem:[#allocation9 + $0x3]] }
 0x181   : > { %v1454_v29 = vrot.slane %v1450_v19, 4  ;;  %v1473_v45 = vstv %s3461_s27  ;;  %v1434_v7 = vadd.f32 %v1430_v41, %v1422_v25  ;;  %v1485_v11 = vstv %s3474_s17  ;;  %s3559_s7 = sld [smem:[#allocation8 + $0x202]] }
 0x182   : > { %v1435_v21 = vadd.f32 %v1431_v31, %v1423_v26  ;;  %v1455_v2 = vrot.slane %v1451_v13, 4  ;;  %v1474_v58 = vmul.f32 %v1473_v45, %v3077_v62  ;;  %v1466_v30 = vrot.slane %v1462_v20, 5  ;;  %s3561_s21 = sld [smem:[#allocation8 + $0x203]] }
 0x183   : > { %v1467_v43 = vrot.slane %v1463_v50, 5  ;;  %v1475_v8 = vmul.f32 %v1473_v45, %v3206_v18  ;;  %v1446_v9 = vadd.f32 %v1442_v39, %v1434_v7  ;;  %v1497_v49 = vstv %s3464_s2  ;;  %s3565_s0 = sld [smem:[#allocation8 + $0x204]] }
 0x184   : > { %v1447_v36 = vadd.f32 %v1443_v34, %v1435_v21  ;;  %v1478_v3 = vrot.slane %v1474_v58, 6  ;;  %v1498_v32 = vmul.f32 %v1497_v49, %v3073_v61  ;;  %v1499_v55 = vmul.f32 %v1497_v49, %v3202_v51  ;;  %s3577_s20 = sld [smem:[#allocation8 + $0x205]] }
 0x185   : > { %v1479_v16 = vrot.slane %v1475_v8, 6  ;;  %v1501_v48 = vstv %s3468_s22  ;;  %v1458_v44 = vadd.f32 %v1454_v29, %v1446_v9  ;;  %v1513_v60 = vstv %s3480_s24  ;;  %s3579_s4 = sld [smem:[#allocation8 + $0x206]] }
 0x186   : > { %v1459_v14 = vadd.f32 %v1455_v2, %v1447_v36  ;;  %v1502_v4 = vmul.f32 %v1501_v48, %v3073_v61  ;;  %v1503_v59 = vmul.f32 %v1501_v48, %v3202_v51  ;;  %v1525_v38 = vstv %s3485_s28  ;;  %s3589_s27 = sld [smem:[#allocation8 + $0x207]] }
 0x187   : > { %v1537_v10 = vstv %s3488_s29  ;;  %v1549_v56 = vstv %s3491_s9  ;;  %v1470_v17 = vadd.f32 %v1466_v30, %v1458_v44  ;;  %v1514_v52 = vmul.f32 %v1513_v60, %v3073_v61  ;;  %s3595_s2 = sld [smem:[#allocation8 + $0x208]] }
 0x188   : > { %v1471_v40 = vadd.f32 %v1467_v43, %v1459_v14  ;;  %v1506_v42 = vrot.slane %v1502_v4, 1  ;;  %v1507_v5 = vrot.slane %v1503_v59, 1  ;;  %v1515_v63 = vmul.f32 %v1513_v60, %v3202_v51  ;;  %s3597_s22 = sld [smem:[#allocation8 + $0x209]] }
 0x189   : > { %v1526_v23 = vmul.f32 %v1525_v38, %v3073_v61  ;;  %v1527_v22 = vmul.f32 %v1525_v38, %v3202_v51  ;;  %v1482_v57 = vadd.f32 %v1478_v3, %v1470_v17  ;;  %v1518_v53 = vrot.slane %v1514_v52, 2  ;;  %s3599_s17 = sld [smem:[#allocation8 + $0x20a]] }
 0x18a   : > { %v1483_v24 = vadd.f32 %v1479_v16, %v1471_v40  ;;  %v1510_v35 = vadd.f32 %v1506_v42, %v1498_v32  ;;  %v1511_v0 = vadd.f32 %v1507_v5, %v1499_v55  ;;  %v1519_v46 = vrot.slane %v1515_v63, 2  ;;  %s3601_s24 = sld [smem:[#allocation8 + $0x20b]] }
 0x18b   : > { %v1530_v47 = vrot.slane %v1526_v23, 3  ;;  %v1531_v1 = vrot.slane %v1527_v22, 3  ;;  %v1486_v15 = vadd.f32 %v1485_v11, %v1482_v57  ;;  %v1538_v37 = vmul.f32 %v1537_v10, %v3073_v61  ;;  %s3607_s28 = sld [smem:[#allocation8 + $0x20c]] }
 0x18c   : > { %v1487_v12 = vadd.f32 %v1485_v11, %v1483_v24  ;;  %v1539_v27 = vmul.f32 %v1537_v10, %v3202_v51  ;;  %v1522_v54 = vadd.f32 %v1518_v53, %v1510_v35  ;;  %v1523_v41 = vadd.f32 %v1519_v46, %v1511_v0  ;;  %s3615_s29 = sld [smem:[#allocation8 + $0x20d]] }
 0x18d   : > { %v1550_v6 = vmul.f32 %v1549_v56, %v3073_v61  ;;  %v1551_v31 = vmul.f32 %v1549_v56, %v3202_v51  ;;  %v1542_v34 = vrot.slane %v1538_v37, 4  ;;  %v1561_v25 = vstv %s3507_s3  ;;  %s3623_s9 = sld [smem:[#allocation9 + $0x4]] }
 0x18e   : > { %v1490_v39 = vrot.slane %v1487_v12, 7  ;;  %v1543_v19 = vrot.slane %v1539_v27, 4  ;;  %v1534_v26 = vadd.f32 %v1530_v47, %v1522_v54  ;;  %v1535_v13 = vadd.f32 %v1531_v1, %v1523_v41  ;;  %s3627_s3 = sld [smem:[#allocation8 + $0x280]] }
 0x18f   : > { %v1554_v28 = vrot.slane %v1550_v6, 5  ;;  %v1555_v29 = vrot.slane %v1551_v31, 5  ;;  %v1562_v50 = vmul.f32 %v1561_v25, %v3073_v61  ;;  %v1563_v45 = vmul.f32 %v1561_v25, %v3202_v51 }
 0x190   : > { %v1491_v20 = vsel %vm1155_vm10, %v1486_v15, %v1490_v39  ;;  %v1573_v7 = vstv %s3513_s10  ;;  %v1546_v21 = vadd.f32 %v1542_v34, %v1534_v26  ;;  %v1547_v2 = vadd.f32 %v1543_v19, %v1535_v13  ;;  %s3633_s10 = sld [smem:[#allocation8 + $0x281]] }
 0x191   : > { %2253 = vst.msk [vmem:[%s3441_s1 + $0x2] ss:$8 sm:$0x3] %vm3395_vm11, %v1491_v20  ;;  %v1574_v58 = vmul.f32 %v1573_v7, %v3077_v62  ;;  %v1575_v30 = vmul.f32 %v1573_v7, %v3206_v18  ;;  %v1566_v43 = vrot.slane %v1562_v50, 6  ;;  %v1567_v8 = vrot.slane %v1563_v45, 6 }
 0x192   : > { %v1579_v11 = vstv %s3519_s12  ;;  %v1591_v9 = vstv %s3521_s23  ;;  %v1558_v36 = vadd.f32 %v1554_v28, %v1546_v21  ;;  %v1559_v3 = vadd.f32 %v1555_v29, %v1547_v2  ;;  %s3639_s12 = sld [smem:[#allocation8 + $0x282]] }
 0x193   : > { %v1580_v49 = vmul.f32 %v1579_v11, %v3077_v62  ;;  %v1581_v16 = vmul.f32 %v1579_v11, %v3206_v18  ;;  %v1592_v32 = vmul.f32 %v1591_v9, %v3077_v62  ;;  %v1593_v55 = vmul.f32 %v1591_v9, %v3206_v18  ;;  %s3643_s23 = sld [smem:[#allocation8 + $0x283]] }
 0x194   : > { %v1603_v48 = vstv %s3523_s8  ;;  %v1615_v44 = vstv %s3527_s11  ;;  %v1570_v14 = vadd.f32 %v1566_v43, %v1558_v36  ;;  %v1571_v4 = vadd.f32 %v1567_v8, %v1559_v3  ;;  %s3651_s8 = sld [smem:[#allocation8 + $0x284]] }
 0x195   : > { %v1584_v59 = vrot.slane %v1580_v49, 1  ;;  %v1585_v60 = vrot.slane %v1581_v16, 1  ;;  %v1596_v38 = vrot.slane %v1592_v32, 2  ;;  %v1597_v10 = vrot.slane %v1593_v55, 2  ;;  %s3655_s11 = sld [smem:[#allocation8 + $0x285]] }
 0x196   : > { %v1604_v56 = vmul.f32 %v1603_v48, %v3077_v62  ;;  %v1605_v17 = vmul.f32 %v1603_v48, %v3206_v18  ;;  %v1576_v40 = vadd.f32 %v1574_v58, %v1570_v14  ;;  %v1577_v42 = vadd.f32 %v1575_v30, %v1571_v4 }
 0x197   : > { %v1616_v5 = vmul.f32 %v1615_v44, %v3077_v62  ;;  %v1617_v52 = vmul.f32 %v1615_v44, %v3206_v18  ;;  %v1627_v22 = vstv %s3532_s13  ;;  %v1639_v57 = vstv %s3538_s16  ;;  %s3663_s13 = sld [smem:[#allocation8 + $0x286]] }
 0x198   : > { %v1608_v63 = vrot.slane %v1604_v56, 3  ;;  %v1609_v23 = vrot.slane %v1605_v17, 3  ;;  %v1588_v24 = vadd.f32 %v1584_v59, %v1576_v40  ;;  %v1589_v35 = vadd.f32 %v1585_v60, %v1577_v42  ;;  %s3669_s16 = sld [smem:[#allocation8 + $0x287]] }
 0x199   : > { %v1620_v0 = vrot.slane %v1616_v5, 4  ;;  %v1621_v53 = vrot.slane %v1617_v52, 4  ;;  %v1628_v46 = vmul.f32 %v1627_v22, %v3077_v62  ;;  %v1629_v47 = vmul.f32 %v1627_v22, %v3206_v18 }
 0x19a   : > { %v1640_v1 = vmul.f32 %v1639_v57, %v3077_v62  ;;  %v1641_v15 = vmul.f32 %v1639_v57, %v3206_v18  ;;  %v1600_v12 = vadd.f32 %v1596_v38, %v1588_v24  ;;  %v1601_v37 = vadd.f32 %v1597_v10, %v1589_v35 }
 0x19b   : > { %v1651_v27 = vstv %s3553_s15  ;;  %v1663_v54 = vstv %s3545_s14  ;;  %v1632_v41 = vrot.slane %v1628_v46, 5  ;;  %v1633_v6 = vrot.slane %v1629_v47, 5  ;;  %s3671_s14 = sld [smem:[#allocation8 + $0x288]] }
 0x19c   : > { %v1644_v31 = vrot.slane %v1640_v1, 6  ;;  %v1645_v39 = vrot.slane %v1641_v15, 6  ;;  %v1612_v34 = vadd.f32 %v1608_v63, %v1600_v12  ;;  %v1613_v19 = vadd.f32 %v1609_v23, %v1601_v37  ;;  %s3677_s15 = sld [smem:[#allocation8 + $0x28a]] }
 0x19d   : > { %v1664_v25 = vmul.f32 %v1663_v54, %v3073_v61  ;;  %v1665_v26 = vmul.f32 %v1663_v54, %v3202_v51  ;;  %v1667_v13 = vstv %s3549_s26  ;;  %v1679_v28 = vstv %s3559_s7  ;;  %s3673_s26 = sld [smem:[#allocation8 + $0x289]] }
 0x19e   : > { %v1691_v29 = vstv %s3561_s21  ;;  %v1703_v20 = vstv %s3565_s0  ;;  %v1624_v50 = vadd.f32 %v1620_v0, %v1612_v34  ;;  %v1625_v45 = vadd.f32 %v1621_v53, %v1613_v19  ;;  %s3681_s7 = sld [smem:[#allocation8 + $0x28b]] }
 0x19f   : > { %v1668_v7 = vmul.f32 %v1667_v13, %v3073_v61  ;;  %v1669_v21 = vmul.f32 %v1667_v13, %v3202_v51  ;;  %v1680_v2 = vmul.f32 %v1679_v28, %v3073_v61  ;;  %v1681_v58 = vmul.f32 %v1679_v28, %v3202_v51  ;;  %s3688_s21 = sld [smem:[#allocation8 + $0x28c]] }
 0x1a0   : > { %v1692_v30 = vmul.f32 %v1691_v29, %v3073_v61  ;;  %v1693_v43 = vmul.f32 %v1691_v29, %v3202_v51  ;;  %v1636_v8 = vadd.f32 %v1632_v41, %v1624_v50  ;;  %v1637_v11 = vadd.f32 %v1633_v6, %v1625_v45  ;;  %s3692_s0 = sld [smem:[#allocation8 + $0x28d]] }
 0x1a1   : > { %v1672_v9 = vrot.slane %v1668_v7, 1  ;;  %v1673_v36 = vrot.slane %v1669_v21, 1  ;;  %v1684_v3 = vrot.slane %v1680_v2, 2  ;;  %v1685_v49 = vrot.slane %v1681_v58, 2 }
 0x1a2   : > { %v1696_v16 = vrot.slane %v1692_v30, 3  ;;  %v1697_v32 = vrot.slane %v1693_v43, 3  ;;  %v1648_v55 = vadd.f32 %v1644_v31, %v1636_v8  ;;  %v1649_v48 = vadd.f32 %v1645_v39, %v1637_v11 }
 0x1a3   : > { %v1676_v44 = vadd.f32 %v1672_v9, %v1664_v25  ;;  %v1677_v14 = vadd.f32 %v1673_v36, %v1665_v26  ;;  %v1704_v4 = vmul.f32 %v1703_v20, %v3073_v61  ;;  %v1705_v59 = vmul.f32 %v1703_v20, %v3202_v51 }
 0x1a4   : > { %v1715_v60 = vstv %s3577_s20  ;;  %v1727_v38 = vstv %s3579_s4  ;;  %v1652_v10 = vadd.f32 %v1651_v27, %v1648_v55  ;;  %v1653_v56 = vadd.f32 %v1651_v27, %v1649_v48  ;;  %s2300_s20 = sld [smem:[#allocation9 + $0x5]] }
 0x1a5   : > { %v1688_v17 = vadd.f32 %v1684_v3, %v1676_v44  ;;  %v1689_v40 = vadd.f32 %v1685_v49, %v1677_v14  ;;  %v1708_v42 = vrot.slane %v1704_v4, 4  ;;  %v1709_v5 = vrot.slane %v1705_v59, 4 }
 0x1a6   : > { %v1716_v52 = vmul.f32 %v1715_v60, %v3073_v61  ;;  %v1717_v63 = vmul.f32 %v1715_v60, %v3202_v51  ;;  %v1656_v23 = vrot.slane %v1653_v56, 7  ;;  %v1728_v24 = vmul.f32 %v1727_v38, %v3073_v61 }
 0x1a7   : > { %v1700_v22 = vadd.f32 %v1696_v16, %v1688_v17  ;;  %v1701_v57 = vadd.f32 %v1697_v32, %v1689_v40  ;;  %v1729_v53 = vmul.f32 %v1727_v38, %v3202_v51  ;;  %v1739_v46 = vstv %s3589_s27 }
 0x1a8   : > { %v1720_v35 = vrot.slane %v1716_v52, 5  ;;  %v1721_v0 = vrot.slane %v1717_v63, 5  ;;  %v1657_v47 = vsel %vm1155_vm10, %v1652_v10, %v1656_v23  ;;  %v1732_v12 = vrot.slane %v1728_v24, 6 }
 0x1a9   : > { %v1712_v1 = vadd.f32 %v1708_v42, %v1700_v22  ;;  %v1713_v15 = vadd.f32 %v1709_v5, %v1701_v57  ;;  %2269 = vst.msk [vmem:[%s3441_s1 + $0x3] ss:$8 sm:$0x3] %vm3395_vm11, %v1657_v47  ;;  %v1733_v37 = vrot.slane %v1729_v53, 6  ;;  %v1740_v27 = vmul.f32 %v1739_v46, %v3077_v62 }
 0x1aa   : > { %v1741_v54 = vmul.f32 %v1739_v46, %v3206_v18  ;;  %v1745_v41 = vstv %s3595_s2  ;;  %v1757_v19 = vstv %s3597_s22  ;;  %v1769_v25 = vstv %s3599_s17  ;;  %s2026_s2 = scalar_lea.hbm %s3762_s6, %s2312_s30  ;;  %s2028_s22 = sshll.u32 %s3441_s1, 4  ;;  %s2029_s22 = int_to_ptr.vmem [resolvable:$true] %s2028_s22 }
 0x1ab   : > { %v1724_v6 = vadd.f32 %v1720_v35, %v1712_v1  ;;  %v1725_v31 = vadd.f32 %v1721_v0, %v1713_v15  ;;  %v1746_v39 = vmul.f32 %v1745_v41, %v3077_v62  ;;  %v1747_v34 = vmul.f32 %v1745_v41, %v3206_v18  ;;  %s2030_s17 = sshll.u32 %s2026_s2, 4  ;;  %s2031_s17 = int_to_ptr.hbm [resolvable:$true] %s2030_s17 }
 0x1ac   : > { %v1781_v26 = vstv %s3601_s24  ;;  %v1793_v13 = vstv %s3607_s28  ;;  %v1758_v45 = vmul.f32 %v1757_v19, %v3077_v62  ;;  %v1759_v7 = vmul.f32 %v1757_v19, %v3206_v18  ;;  %s2531_s24 = sshra.s32 %s2031_s17, 4  ;;  %s2532_s24 = int_to_ptr.hbm [resolvable:$true] %s2531_s24 }
 0x1ad   : > { %v1736_v28 = vadd.f32 %v1732_v12, %v1724_v6  ;;  %v1737_v29 = vadd.f32 %v1733_v37, %v1725_v31  ;;  %v1750_v20 = vrot.slane %v1746_v39, 1  ;;  %v1751_v50 = vrot.slane %v1747_v34, 1  ;;  %s2533_s28 = scalar_lea.hbm %s2532_s24, 16  ;;  %p2538_p3 = scmp.lt.s32.totalorder %s2532_s24, %s3762_s6 }
 0x1ae   : > { %v1770_v21 = vmul.f32 %v1769_v25, %v3077_v62  ;;  %v1771_v2 = vmul.f32 %v1769_v25, %v3206_v18  ;;  %v1782_v43 = vmul.f32 %v1781_v26, %v3077_v62  ;;  %v1783_v8 = vmul.f32 %v1781_v26, %v3206_v18  ;;  %p2534_p13 = scmp.ne.s32.totalorder %s2532_s24, %s2533_s28 }
 0x1af   : > { %v1742_v58 = vadd.f32 %v1740_v27, %v1736_v28  ;;  %v1743_v30 = vadd.f32 %v1741_v54, %v1737_v29  ;;  %v1762_v11 = vrot.slane %v1758_v45, 2  ;;  %v1763_v9 = vrot.slane %v1759_v7, 2 }
 0x1b0   : > { %v1774_v36 = vrot.slane %v1770_v21, 3  ;;  %v1775_v3 = vrot.slane %v1771_v2, 3  ;;  %v1786_v32 = vrot.slane %v1782_v43, 4  ;;  %v1787_v55 = vrot.slane %v1783_v8, 4  ;;  %p2535_p9 = pnand %p2534_p13, %p2714_p5 }
 0x1b1   : > { %v1754_v49 = vadd.f32 %v1750_v20, %v1742_v58  ;;  %v1755_v16 = vadd.f32 %v1751_v50, %v1743_v30  ;;  %v1794_v48 = vmul.f32 %v1793_v13, %v3077_v62  ;;  %v1795_v44 = vmul.f32 %v1793_v13, %v3206_v18 }
 0x1b2   : > { %v1805_v14 = vstv %s3615_s29  ;;  %v1817_v4 = vstv %s3623_s9  ;;  %v1829_v40 = vstv %s3627_s3  ;;  %v1833_v42 = vstv %s3633_s10  ;;  %p2536_p0 = pneg %p2535_p9  ;;  %s2537_s9 = scalar_lea.hbm %s3762_s6, 32 }
 0x1b3   : > { %v1766_v59 = vadd.f32 %v1762_v11, %v1754_v49  ;;  %v1767_v60 = vadd.f32 %v1763_v9, %v1755_v16  ;;  %v1806_v38 = vmul.f32 %v1805_v14, %v3077_v62  ;;  %v1807_v10 = vmul.f32 %v1805_v14, %v3206_v18  ;;  %p2539_p7 = scmp.lt.s32.totalorder %s2537_s9, %s2533_s28 }
 0x1b4   : > { %v1798_v56 = vrot.slane %v1794_v48, 5  ;;  %v1799_v17 = vrot.slane %v1795_v44, 5  ;;  %v1830_v22 = vmul.f32 %v1829_v40, %v3073_v61  ;;  %v1831_v57 = vmul.f32 %v1829_v40, %v3202_v51 }
 0x1b5   : > { %v1778_v5 = vadd.f32 %v1774_v36, %v1766_v59  ;;  %v1779_v52 = vadd.f32 %v1775_v3, %v1767_v60  ;;  %v1810_v63 = vrot.slane %v1806_v38, 6  ;;  %v1811_v23 = vrot.slane %v1807_v10, 6  ;;  %p2540_p1 = por %p2539_p7, %p2538_p3 }
 0x1b6   : > { %v1834_v24 = vmul.f32 %v1833_v42, %v3073_v61  ;;  %v1835_v35 = vmul.f32 %v1833_v42, %v3202_v51  ;;  %v1845_v46 = vstv %s3639_s12  ;;  %v1857_v47 = vstv %s3643_s23 }
 0x1b7   : > { %v1790_v0 = vadd.f32 %v1786_v32, %v1778_v5  ;;  %v1791_v53 = vadd.f32 %v1787_v55, %v1779_v52  ;;  %v1846_v12 = vmul.f32 %v1845_v46, %v3073_v61  ;;  %v1847_v37 = vmul.f32 %v1845_v46, %v3202_v51  ;;  %p2541_p4 = pnand %p2540_p1, %p2536_p0 }
 0x1b8   : > { %v1838_v1 = vrot.slane %v1834_v24, 1  ;;  %v1839_v15 = vrot.slane %v1835_v35, 1  ;;  %v1858_v41 = vmul.f32 %v1857_v47, %v3073_v61  ;;  %v1859_v6 = vmul.f32 %v1857_v47, %v3202_v51 }
 0x1b9   : > { %v1802_v27 = vadd.f32 %v1798_v56, %v1790_v0  ;;  %v1803_v54 = vadd.f32 %v1799_v17, %v1791_v53  ;;  %v1850_v34 = vrot.slane %v1846_v12, 2  ;;  %v1851_v19 = vrot.slane %v1847_v37, 2 }
 0x1ba   : > { %v1842_v31 = vadd.f32 %v1838_v1, %v1830_v22  ;;  %v1843_v39 = vadd.f32 %v1839_v15, %v1831_v57  ;;  %v1862_v13 = vrot.slane %v1858_v41, 3  ;;  %v1863_v28 = vrot.slane %v1859_v6, 3 }
 0x1bb   : > { %v1814_v25 = vadd.f32 %v1810_v63, %v1802_v27  ;;  %v1815_v26 = vadd.f32 %v1811_v23, %v1803_v54  ;;  %v1869_v50 = vstv %s3651_s8  ;;  %v1881_v45 = vstv %s3655_s11 }
 0x1bc   : > { %v1854_v29 = vadd.f32 %v1850_v34, %v1842_v31  ;;  %v1855_v20 = vadd.f32 %v1851_v19, %v1843_v39  ;;  %v1870_v2 = vmul.f32 %v1869_v50, %v3073_v61  ;;  %v1871_v58 = vmul.f32 %v1869_v50, %v3202_v51 }
 0x1bd   : > { %v1818_v7 = vadd.f32 %v1817_v4, %v1814_v25  ;;  %v1819_v21 = vadd.f32 %v1817_v4, %v1815_v26  ;;  %v1882_v8 = vmul.f32 %v1881_v45, %v3073_v61  ;;  %v1883_v11 = vmul.f32 %v1881_v45, %v3202_v51 }
 0x1be   : > { %v1866_v30 = vadd.f32 %v1862_v13, %v1854_v29  ;;  %v1867_v43 = vadd.f32 %v1863_v28, %v1855_v20  ;;  %v1874_v36 = vrot.slane %v1870_v2, 4  ;;  %v1875_v3 = vrot.slane %v1871_v58, 4 }
 0x1bf   : > { %v1822_v9 = vrot.slane %v1819_v21, 7  ;;  %v1893_v49 = vstv %s3663_s13  ;;  %v1886_v16 = vrot.slane %v1882_v8, 5  ;;  %v1887_v32 = vrot.slane %v1883_v11, 5 }
 0x1c0   : > { %v1894_v55 = vmul.f32 %v1893_v49, %v3073_v61  ;;  %v1895_v48 = vmul.f32 %v1893_v49, %v3202_v51  ;;  %v1878_v14 = vadd.f32 %v1874_v36, %v1866_v30  ;;  %v1879_v4 = vadd.f32 %v1875_v3, %v1867_v43 }
 0x1c1   : > { %v1823_v44 = vsel %vm1155_vm10, %v1818_v7, %v1822_v9  ;;  %v1905_v59 = vstv %s3669_s16  ;;  %v1911_v17 = vstv %s3671_s14  ;;  %v1923_v40 = vstv %s3673_s26 }
 0x1c2   : > { %2285 = vst.msk [vmem:[%s3441_s1 + $0x4] ss:$8 sm:$0x3] %vm3395_vm11, %v1823_v44  ;;  %v1898_v60 = vrot.slane %v1894_v55, 6  ;;  %v1899_v38 = vrot.slane %v1895_v48, 6  ;;  %v1906_v61 = vmul.f32 %v1905_v59, %v3077_v62  ;;  %v1907_v51 = vmul.f32 %v1905_v59, %v3206_v18 }
 0x1c3   : > { %v1890_v10 = vadd.f32 %v1886_v16, %v1878_v14  ;;  %v1891_v56 = vadd.f32 %v1887_v32, %v1879_v4  ;;  %v1912_v42 = vmul.f32 %v1911_v17, %v3077_v62  ;;  %v1913_v5 = vmul.f32 %v1911_v17, %v3206_v18 }
 0x1c4   : > { %v1924_v52 = vmul.f32 %v1923_v40, %v3077_v62  ;;  %v1925_v63 = vmul.f32 %v1923_v40, %v3206_v18  ;;  %v1935_v57 = vstv %s3677_s15  ;;  %v1947_v24 = vstv %s3681_s7 }
 0x1c5   : > { %v1902_v23 = vadd.f32 %v1898_v60, %v1890_v10  ;;  %v1903_v22 = vadd.f32 %v1899_v38, %v1891_v56  ;;  %v1916_v35 = vrot.slane %v1912_v42, 1  ;;  %v1917_v0 = vrot.slane %v1913_v5, 1 }
 0x1c6   : > { %v1936_v47 = vmul.f32 %v1935_v57, %v3077_v62  ;;  %v1937_v1 = vmul.f32 %v1935_v57, %v3206_v18  ;;  %v1948_v15 = vmul.f32 %v1947_v24, %v3077_v62  ;;  %v1949_v12 = vmul.f32 %v1947_v24, %v3206_v18 }
 0x1c7   : > { %v1908_v53 = vadd.f32 %v1906_v61, %v1902_v23  ;;  %v1909_v46 = vadd.f32 %v1907_v51, %v1903_v22  ;;  %v1959_v37 = vstv %s3688_s21  ;;  %v1928_v41 = vrot.slane %v1924_v52, 2 }
 0x1c8   : > { %v1929_v6 = vrot.slane %v1925_v63, 2  ;;  %v1940_v31 = vrot.slane %v1936_v47, 3  ;;  %v1941_v39 = vrot.slane %v1937_v1, 3  ;;  %v1971_v34 = vstv %s3692_s0 }
 0x1c9   : > { %v1920_v27 = vadd.f32 %v1916_v35, %v1908_v53  ;;  %v1921_v54 = vadd.f32 %v1917_v0, %v1909_v46  ;;  %v1960_v26 = vmul.f32 %v1959_v37, %v3077_v62  ;;  %v1961_v13 = vmul.f32 %v1959_v37, %v3206_v18 }
 0x1ca   : > { %v1952_v28 = vrot.slane %v1948_v15, 4  ;;  %v1953_v29 = vrot.slane %v1949_v12, 4  ;;  %v1972_v45 = vmul.f32 %v1971_v34, %v3077_v62  ;;  %v1973_v7 = vmul.f32 %v1971_v34, %v3206_v18 }
 0x1cb   : > { %v1932_v19 = vadd.f32 %v1928_v41, %v1920_v27  ;;  %v1933_v25 = vadd.f32 %v1929_v6, %v1921_v54  ;;  %v1964_v58 = vrot.slane %v1960_v26, 5  ;;  %v1965_v30 = vrot.slane %v1961_v13, 5 }
 0x1cc   : > { %v1976_v11 = vrot.slane %v1972_v45, 6  ;;  %v1977_v9 = vrot.slane %v1973_v7, 6  ;;  %v1983_v36 = vstv %s2300_s20 }
 0x1cd   : > { %v1944_v20 = vadd.f32 %v1940_v31, %v1932_v19  ;;  %v1945_v50 = vadd.f32 %v1941_v39, %v1933_v25 }
 0x1cf   : > { %v1956_v21 = vadd.f32 %v1952_v28, %v1944_v20  ;;  %v1957_v2 = vadd.f32 %v1953_v29, %v1945_v50 }
 0x1d1   : > { %v1968_v43 = vadd.f32 %v1964_v58, %v1956_v21  ;;  %v1969_v8 = vadd.f32 %v1965_v30, %v1957_v2 }
 0x1d3   : > { %v1980_v3 = vadd.f32 %v1976_v11, %v1968_v43  ;;  %v1981_v62 = vadd.f32 %v1977_v9, %v1969_v8 }
 0x1d5   : > { %v1985_v18 = vadd.f32 %v1983_v36, %v1981_v62  ;;  %v1984_v49 = vadd.f32 %v1983_v36, %v1980_v3 }
 0x1d7   : > { %v1988_v16 = vrot.slane %v1985_v18, 7 }
 0x1d9   : > { %v1989_v32 = vsel %vm1155_vm10, %v1984_v49, %v1988_v16 }
 0x1da   : > { %2301 = vst.msk [vmem:[%s3441_s1 + $0x5] ss:$8 sm:$0x3] %vm3395_vm11, %v1989_v32 }
 0x1db   : > { %2544 = shalt.err (!%p2541_p4)
}
 0x1dc   : > { %2327 = dma.vmem_to_hbm [thread:$0]  (%p2714_p5), %s2029_s22, 256, %s2031_s17, %s2000_s25  }
 0x1dd PF: > { %s3796_s19 = sld [smem:[#allocation20_spill]] }
 0x1de   : > { %s3798_s12 = sld [smem:[#allocation23_spill]] }
 0x1e3   : > { %s2042_s23 = sand.u32 1, %s3796_s19  }
 0x1e4   : > { %p3799_p8 = scmp.ge.s32.totalorder %s3798_s12, 2  ;;  %s2043_s8 = scalar_lea.sflag [#allocation4], %s2042_s23 }
 0x1e6   : > { %p2345_p2 = pnand %p3799_p8, %p2680_p6 }
 0x1e8   : > { %p2346_p11 = pneg %p2345_p2 }
 0x1ea   : > { %2578 = dma.done.wait (%p2346_p11), %s2043_s8, 256  }
 0x1eb   : > { %2580 = vsyncadd (%p2346_p11), %s2043_s8, 4294967040  ;;  %s2053_s11 = scalar_lea.sflag [#allocation13], %s2042_s23 }
 0x1ec   : > { %2582 = dma.done.wait (%p2346_p11), %s2053_s11, 256  }
 0x1ed   : > { %2584 = vsyncadd (%p2346_p11), %s2053_s11, 4294967040  ;;  %s3800_s24 = sld [smem:[#allocation25_spill]] }
 0x1ee   : > { %s3801_s21 = sld [smem:[#allocation21_spill]] }
 0x1ef   : > { %s3802_s22 = sld [smem:[#allocation22_spill]] }
 0x1f0   : > { %s3803_s23 = sld [smem:[#allocation26_spill]] }
 0x1f3   : > { %p28_p5 = scmp.ge.s32.totalorder %s3800_s24, 4  }
 0x1f5   :  { %30 = sbr.rel (!%p28_p5) target bundleno = 17 (0x11), region = 129 }
 0x1fa   :  { %2059 = vsyncpa [#allocation3], 1 }
 0x1fb   :  { %2061 = vsyncpa [#allocation3 + $0x1], 1 }
 0x1fc   :  { %2062 = vsyncpa [#allocation7], 1 }
 0x1fd   :  { %2064 = vsyncpa [#allocation7 + $0x1], 1 }
 0x1fe   :  { %2065 = vsyncpa [#allocation4], 1 }
 0x1ff   :  { %2067 = vsyncpa [#allocation4 + $0x1], 1 }
 0x200   :  { %2068 = vsyncpa [#allocation13], 1 }
 0x201   :  { %2070 = vsyncpa [#allocation13 + $0x1], 1 }
 0x202   :  { %2071 = vsyncpa [#allocation5], 1 }
 0x203   :  { %2073 = vsyncpa [#allocation5 + $0x1], 1 }
 0x204   :  { %2074 = vsyncpa [#allocation10], 1 }

</bundles_post_ra>
